<compile_context>
chip_gen: v7x
topology: tpu7x:2x2x1
jax: 0.10.0
libtpu: 0.0.40
codegen_flags: <defaults>
</compile_context>

<pallas_src>
import jax
import jax.numpy as jnp
import numpy as np
from jax.experimental import pallas as pl
from jax.experimental.pallas import tpu as pltpu

K = 4                      # in_dim (number of users)
TWO_K = 2 * K
CNN_CHAN = 64
CONV_OUT = CNN_CHAN * K    # 256  (flattened conv output per batch row)
NFEAT = 3 * TWO_K          # 24   (concat of x, grad, x_obm)
H1, H2, H3 = 128, 64, 32
BN_EPS = 1e-5
NORM_EPS = 1e-12

# Packed-weight row offsets (all multiples of 8 -> clean sublane slices).
R_WBIG = 0
R_W1 = R_WBIG + NFEAT        # 24
R_W2 = R_W1 + CONV_OUT       # 280
R_W3 = R_W2 + H1             # 408
R_W4 = R_W3 + H2             # 472
R_END = R_W4 + H3            # 504

# Packed small-parameter rows (each row padded to 256 lanes).
P_CONV_B, P_BN_G, P_BN_B = 0, 1, 2
P_B1, P_G1, P_BE1 = 3, 4, 5
P_B2, P_G2, P_BE2 = 6, 7, 8
P_B3, P_G3, P_BE3 = 9, 10, 11
P_B4 = 12
P_ROWS = 13


def _full_spec(shape):
    """BlockSpec covering the whole array (grid=(1,))."""
    n = len(shape)
    return pl.BlockSpec(shape, lambda i, n=n: (0,) * n)


# ----------------------------------------------------------------------------
# Single fused kernel: OBMNet step -> conv(as matmul)+ReLU+BN -> MLP head.
# ----------------------------------------------------------------------------
def net_one_bit_kernel(x_ref, g_ref, smt_ref, wpk_ref, ppk_ref, alpha_ref,
                       out_ref):
    B = x_ref.shape[0]
    C = CNN_CHAN
    x = x_ref[...]                                   # [B, 2K]
    G = g_ref[...]                                   # [B, M, 2K]
    alpha = alpha_ref[0, 0]                          # SMEM scalar

    # ---- OBMNet gradient step (VPU broadcast+reduce; too small for the MXU) --
    s = jax.nn.sigmoid(-jnp.sum(G * x[:, None, :], axis=-1))    # [B, M]
    d = jnp.sum(G * s[:, :, None], axis=1)                      # [B, 2K]
    step = jnp.dot(d, smt_ref[...], preferred_element_type=jnp.float32)
    x_obm = x + alpha * step                                    # [B, 2K]
    nrm = jnp.sqrt(jnp.sum(d * d, axis=-1, keepdims=True))
    grad = d / jnp.maximum(nrm, NORM_EPS)                       # [B, 2K]

    # ---- Conv1d(6, C, 3, padding=1) as one matmul (im2col folded into Wbig) --
    # TODO(synk): func_to_CNN_chan_three_input is not provided in the source
    # script; assumed channel order [x_re, x_im, grad_re, grad_im, xobm_re,
    # xobm_im] (same assumption as the pure-JAX reference below).
    feat = jnp.concatenate([x, grad, x_obm], axis=-1)           # [B, 24]
    y = jnp.dot(feat, wpk_ref[R_WBIG:R_W1, :],
                preferred_element_type=jnp.float32)
    y = y + ppk_ref[P_CONV_B:P_CONV_B + 1, :]                   # tiled conv bias
    y = jnp.maximum(y, 0.0)                                     # ReLU (pre-BN)

    # ---- BatchNorm1d(C) over (batch, position); columns are pos-major p*C+c --
    n = float(B * K)
    s1 = jnp.sum(y, axis=0, keepdims=True)                      # [1, 4C]
    mean = (s1[:, 0:C] + s1[:, C:2 * C]
            + s1[:, 2 * C:3 * C] + s1[:, 3 * C:4 * C]) / n      # [1, C]
    mean_full = jnp.concatenate([mean, mean, mean, mean], axis=-1)
    diff = y - mean_full
    s2 = jnp.sum(diff * diff, axis=0, keepdims=True)
    var = (s2[:, 0:C] + s2[:, C:2 * C]
           + s2[:, 2 * C:3 * C] + s2[:, 3 * C:4 * C]) / n       # [1, C]
    inv = jax.lax.rsqrt(var + BN_EPS)
    inv_full = jnp.concatenate([inv, inv, inv, inv], axis=-1)
    h = (ppk_ref[P_BN_G:P_BN_G + 1, :] * diff * inv_full
         + ppk_ref[P_BN_B:P_BN_B + 1, :])                       # [B, 4C] = x_cnn

    # ---- MLP head: (fc -> BN(batch stats) -> ReLU) x3, then fc4 ----
    def lin_bn_relu(h, w, b, g, be):
        h = jnp.dot(h, w, preferred_element_type=jnp.float32) + b
        m = jnp.mean(h, axis=0, keepdims=True)
        v = jnp.mean((h - m) ** 2, axis=0, keepdims=True)
        return jnp.maximum(g * (h - m) * jax.lax.rsqrt(v + BN_EPS) + be, 0.0)

    h = lin_bn_relu(h, wpk_ref[R_W1:R_W2, 0:H1],
                    ppk_ref[P_B1:P_B1 + 1, 0:H1],
                    ppk_ref[P_G1:P_G1 + 1, 0:H1],
                    ppk_ref[P_BE1:P_BE1 + 1, 0:H1])
    h = lin_bn_relu(h, wpk_ref[R_W2:R_W3, 0:H2],
                    ppk_ref[P_B2:P_B2 + 1, 0:H2],
                    ppk_ref[P_G2:P_G2 + 1, 0:H2],
                    ppk_ref[P_BE2:P_BE2 + 1, 0:H2])
    h = lin_bn_relu(h, wpk_ref[R_W3:R_W4, 0:H3],
                    ppk_ref[P_B3:P_B3 + 1, 0:H3],
                    ppk_ref[P_G3:P_G3 + 1, 0:H3],
                    ppk_ref[P_BE3:P_BE3 + 1, 0:H3])
    delta = jnp.dot(h, wpk_ref[R_W4:R_END, 0:TWO_K],
                    preferred_element_type=jnp.float32)
    delta = delta + ppk_ref[P_B4:P_B4 + 1, 0:TWO_K]
    out_ref[...] = x_obm + delta                                # [B, 2K]


# ----------------------------------------------------------------------------
# One-time parameter packing (layout plumbing outside the hot path).
# ----------------------------------------------------------------------------
def pack_params(params):
    C = CNN_CHAN
    conv_w = np.asarray(params['conv_w'], dtype=np.float32)      # [C, 6, 3]

    # Conv1d(6,C,3,pad=1) + im2col folded into Wbig: feat[b] @ Wbig gives the
    # conv output flattened pos-major (col = p*C + c).  feat columns are
    # src*2K + half*K + j  with src in {x, grad, x_obm}, half in {re, im}.
    wbig = np.zeros((NFEAT, CONV_OUT), np.float32)
    for cin in range(6):
        src, half = divmod(cin, 2)
        for j in range(K):
            fcol = src * TWO_K + half * K + j
            for p in range(K):
                k = j - p + 1
                if 0 <= k < 3:
                    wbig[fcol, p * C:(p + 1) * C] = conv_w[:, cin, k]

    # fc1 weight rows permuted from torch's channel-major x_cnn layout
    # (col = c*K + p) to the kernel's pos-major conv output (col = p*C + c).
    w1 = np.asarray(params['w1'], dtype=np.float32)              # [C*K, H1]
    w1p = w1.reshape(C, K, H1).transpose(1, 0, 2).reshape(C * K, H1)

    wpk = np.zeros((R_END, CONV_OUT), np.float32)
    wpk[R_WBIG:R_W1, :] = wbig
    wpk[R_W1:R_W2, :H1] = w1p
    wpk[R_W2:R_W3, :H2] = np.asarray(params['w2'], dtype=np.float32)
    wpk[R_W3:R_W4, :H3] = np.asarray(params['w3'], dtype=np.float32)
    wpk[R_W4:R_END, :TWO_K] = np.asarray(params['w4'], dtype=np.float32)

    ppk = np.zeros((P_ROWS, CONV_OUT), np.float32)
    ppk[P_CONV_B, :] = np.tile(np.asarray(params['conv_b']).reshape(C), K)
    ppk[P_BN_G, :] = np.tile(np.asarray(params['bn_g']).reshape(C), K)
    ppk[P_BN_B, :] = np.tile(np.asarray(params['bn_b']).reshape(C), K)
    ppk[P_B1, :H1] = np.asarray(params['b1']).reshape(-1)
    ppk[P_G1, :H1] = np.asarray(params['g1']).reshape(-1)
    ppk[P_BE1, :H1] = np.asarray(params['be1']).reshape(-1)
    ppk[P_B2, :H2] = np.asarray(params['b2']).reshape(-1)
    ppk[P_G2, :H2] = np.asarray(params['g2']).reshape(-1)
    ppk[P_BE2, :H2] = np.asarray(params['be2']).reshape(-1)
    ppk[P_B3, :H3] = np.asarray(params['b3']).reshape(-1)
    ppk[P_G3, :H3] = np.asarray(params['g3']).reshape(-1)
    ppk[P_BE3, :H3] = np.asarray(params['be3']).reshape(-1)
    ppk[P_B4, :TWO_K] = np.asarray(params['b4']).reshape(-1)

    alpha = np.asarray(params['alpha'], dtype=np.float32).reshape(1, 1)
    return {'wpk': jnp.asarray(wpk), 'ppk': jnp.asarray(ppk),
            'alpha': jnp.asarray(alpha)}


# ----------------------------------------------------------------------------
# Full Net_One_Bit.forward: one pallas_call + tiny XLA prologue/epilogue.
# ----------------------------------------------------------------------------
def net_one_bit_forward(packed, x_R, G_R, snr_lin, scale_fact):
    # x_R: [2K, B], G_R: [B, M, 2K], scale_fact: complex64 [K]
    # snr_lin is unused by the reference forward (kept for signature parity).
    del snr_lin
    B, M, D = G_R.shape

    re = jnp.diag(jnp.real(scale_fact))
    im = jnp.diag(jnp.imag(scale_fact))
    scale_mat = jnp.concatenate(
        [jnp.concatenate([re, -im], axis=1),
         jnp.concatenate([im, re], axis=1)], axis=0)             # [2K, 2K]
    smat_t = jnp.transpose(scale_mat)

    x_in = jnp.transpose(x_R)                                    # [B, 2K]
    wpk, ppk, alpha = packed['wpk'], packed['ppk'], packed['alpha']

    out_bm = pl.pallas_call(
        net_one_bit_kernel,
        grid=(1,),
        in_specs=[
            _full_spec((B, D)),                    # x (batch-major)
            _full_spec((B, M, D)),                 # G_R
            _full_spec((D, D)),                    # scale_mat^T
            _full_spec(tuple(wpk.shape)),          # packed weights
            _full_spec(tuple(ppk.shape)),          # packed small params
            pl.BlockSpec(memory_space=pltpu.MemorySpace.SMEM),   # alpha scalar
        ],
        out_specs=_full_spec((B, TWO_K)),
        out_shape=jax.ShapeDtypeStruct((B, TWO_K), jnp.float32),
        compiler_params=pltpu.CompilerParams(
            dimension_semantics=("arbitrary",)),
    )(x_in, G_R, smat_t, wpk, ppk, alpha)

    return jnp.transpose(out_bm)                                 # [2K, B]


# ----------------------------------------------------------------------------
# Pure-JAX reference (mirrors the torch forward) for correctness checking.
# ----------------------------------------------------------------------------
def func_to_cnn_chan_three_input(a_b, b_b, c_b):
    # TODO(synk): func_to_CNN_chan_three_input is not provided in the source
    # script; assumed semantics: split each [B, 2K] tensor into real/imag
    # halves and stack as 6 CNN channels of length K.
    return jnp.stack([a_b[:, :K], a_b[:, K:],
                      b_b[:, :K], b_b[:, K:],
                      c_b[:, :K], c_b[:, K:]], axis=1)           # [B, 6, K]


def reference_forward(params, x_R, G_R, snr_lin, scale_fact):
    del snr_lin
    B = G_R.shape[0]
    re = jnp.diag(jnp.real(scale_fact))
    im = jnp.diag(jnp.imag(scale_fact))
    scale_mat = jnp.concatenate(
        [jnp.concatenate([re, -im], axis=1),
         jnp.concatenate([im, re], axis=1)], axis=0)

    x_in = jnp.transpose(x_R)[:, :, None]                        # [B, 2K, 1]
    G_T = jnp.transpose(G_R, (0, 2, 1))
    d = jax.nn.sigmoid(jnp.matmul(-G_R, x_in))
    d = jnp.matmul(G_T, d)                                       # [B, 2K, 1]
    alpha = params['alpha'][0, 0]
    x_new = x_in + alpha * jnp.matmul(scale_mat[None], d)
    x_obm = x_new[..., 0]
    grad = d[..., 0]
    grad = grad / jnp.maximum(
        jnp.linalg.norm(grad, axis=1, keepdims=True), NORM_EPS)

    in_chan = func_to_cnn_chan_three_input(jnp.transpose(x_R), grad, x_obm)
    y = jax.lax.conv_general_dilated(
        in_chan, params['conv_w'], window_strides=(1,), padding=((1, 1),),
        dimension_numbers=('NCH', 'OIH', 'NCH'))
    y = y + params['conv_b'].reshape(1, CNN_CHAN, 1)
    y = jnp.maximum(y, 0.0)
    mean = jnp.mean(y, axis=(0, 2), keepdims=True)
    var = jnp.mean((y - mean) ** 2, axis=(0, 2), keepdims=True)
    y = (params['bn_g'].reshape(1, CNN_CHAN, 1) * (y - mean)
         * jax.lax.rsqrt(var + BN_EPS) + params['bn_b'].reshape(1, CNN_CHAN, 1))
    x_cnn = y.reshape(B, CNN_CHAN * K)

    def lin_bn_relu(h, w, b, g, be):
        h = h @ w + b
        m = jnp.mean(h, axis=0, keepdims=True)
        v = jnp.mean((h - m) ** 2, axis=0, keepdims=True)
        return jnp.maximum(g * (h - m) * jax.lax.rsqrt(v + BN_EPS) + be, 0.0)

    h = lin_bn_relu(x_cnn, params['w1'], params['b1'], params['g1'], params['be1'])
    h = lin_bn_relu(h, params['w2'], params['b2'], params['g2'], params['be2'])
    h = lin_bn_relu(h, params['w3'], params['b3'], params['g3'], params['be3'])
    dlt = h @ params['w4'] + params['b4']
    return jnp.transpose(x_obm + dlt)


# ----------------------------------------------------------------------------
def init_params(key):
    ks = jax.random.split(key, 20)

    def init(k, shape, scale=0.1):
        return scale * jax.random.normal(k, shape, dtype=jnp.float32)

    return {
        'alpha': 0.01 * jax.random.uniform(ks[0], (1, 1), dtype=jnp.float32),
        'conv_w': init(ks[1], (CNN_CHAN, 6, 3)),
        'conv_b': init(ks[2], (1, CNN_CHAN)),
        'bn_g': 1.0 + init(ks[3], (1, CNN_CHAN)),
        'bn_b': init(ks[4], (1, CNN_CHAN)),
        'w1': init(ks[5], (CNN_CHAN * K, H1)), 'b1': init(ks[6], (1, H1)),
        'g1': 1.0 + init(ks[7], (1, H1)), 'be1': init(ks[8], (1, H1)),
        'w2': init(ks[9], (H1, H2)), 'b2': init(ks[10], (1, H2)),
        'g2': 1.0 + init(ks[11], (1, H2)), 'be2': init(ks[12], (1, H2)),
        'w3': init(ks[13], (H2, H3)), 'b3': init(ks[14], (1, H3)),
        'g3': 1.0 + init(ks[15], (1, H3)), 'be3': init(ks[16], (1, H3)),
        'w4': init(ks[17], (H3, TWO_K)), 'b4': init(ks[18], (1, TWO_K)),
    }


if __name__ == "__main__":
    key = jax.random.PRNGKey(0)
    pkey, dkey = jax.random.split(key)
    params = init_params(pkey)
    packed = pack_params(params)          # one-time layout plumbing

    B, M = 16, 12
    ik = jax.random.split(dkey, 4)
    x_R = jax.random.normal(ik[0], (TWO_K, B), dtype=jnp.float32)
    G_R = jax.random.normal(ik[1], (B, M, TWO_K), dtype=jnp.float32)
    snr_lin = jnp.ones((B,), dtype=jnp.float32)        # unused by forward
    scale_fact = (jax.random.normal(ik[2], (K,), dtype=jnp.float32)
                  + 1j * jax.random.normal(ik[3], (K,), dtype=jnp.float32)
                  ).astype(jnp.complex64)

    out = net_one_bit_forward(packed, x_R, G_R, snr_lin, scale_fact)
    out = jax.block_until_ready(out)

    ref = jax.block_until_ready(
        reference_forward(params, x_R, G_R, snr_lin, scale_fact))

    assert out.shape == (TWO_K, B), out.shape
    np.testing.assert_allclose(np.asarray(out), np.asarray(ref),
                               rtol=2e-3, atol=2e-3)
    print("KERNEL_OK")
</pallas_src>

<mosaic_0001>
module attributes {stable_mosaic.version = 11 : i64} {
  func.func @net_one_bit_kernel(%arg0: i32, %arg1: memref<16x8xf32, #tpu.memory_space<vmem>>, %arg2: memref<16x12x8xf32, #tpu.memory_space<vmem>>, %arg3: memref<8x8xf32, #tpu.memory_space<vmem>>, %arg4: memref<504x256xf32, #tpu.memory_space<vmem>>, %arg5: memref<13x256xf32, #tpu.memory_space<vmem>>, %arg6: memref<1x1xf32, #tpu.memory_space<smem>>, %arg7: memref<16x8xf32, #tpu.memory_space<vmem>>) attributes {dimension_semantics = [#tpu.dimension_semantics<arbitrary>], iteration_bounds = array<i64: 1>, scalar_prefetch = 0 : i64, scratch_operands = 0 : i64, tpu.core_type = #tpu.core_type<tc>, window_params = [{pipeline_mode = #tpu.pipeline_mode<synchronous>, transform_indices = @transform_0, window_bounds = array<i64: 16, 8>}, {pipeline_mode = #tpu.pipeline_mode<synchronous>, transform_indices = @transform_1, window_bounds = array<i64: 16, 12, 8>}, {pipeline_mode = #tpu.pipeline_mode<synchronous>, transform_indices = @transform_2, window_bounds = array<i64: 8, 8>}, {pipeline_mode = #tpu.pipeline_mode<synchronous>, transform_indices = @transform_3, window_bounds = array<i64: 504, 256>}, {pipeline_mode = #tpu.pipeline_mode<synchronous>, transform_indices = @transform_4, window_bounds = array<i64: 13, 256>}, {transform_indices = @transform_5, window_bounds = array<i64: 1, 1>}, {pipeline_mode = #tpu.pipeline_mode<synchronous>, transform_indices = @transform_6, window_bounds = array<i64: 16, 8>}]} {
    %c0 = arith.constant 0 : index
    %c0_0 = arith.constant 0 : index
    %0 = vector.load %arg1[%c0, %c0_0] : memref<16x8xf32, #tpu.memory_space<vmem>>, vector<16x8xf32>
    %c0_1 = arith.constant 0 : index
    %c0_2 = arith.constant 0 : index
    %c0_3 = arith.constant 0 : index
    %1 = vector.load %arg2[%c0_1, %c0_2, %c0_3] : memref<16x12x8xf32, #tpu.memory_space<vmem>>, vector<16x12x8xf32>
    %c0_4 = arith.constant 0 : index
    %c0_5 = arith.constant 0 : index
    %2 = memref.load %arg6[%c0_4, %c0_5] : memref<1x1xf32, #tpu.memory_space<smem>>
    %3 = vector.shape_cast %0 : vector<16x8xf32> to vector<16x1x8xf32>
    %4 = vector.broadcast %3 : vector<16x1x8xf32> to vector<16x12x8xf32>
    %5 = arith.mulf %1, %4 : vector<16x12x8xf32>
    %cst = arith.constant dense<0.000000e+00> : vector<16x12xf32>
    %6 = vector.multi_reduction <add>, %5, %cst [2] : vector<16x12x8xf32> to vector<16x12xf32>
    %cst_6 = arith.constant 0.000000e+00 : f32
    %7 = vector.broadcast %cst_6 : f32 to vector<16x12xf32>
    %8 = arith.subf %7, %6 : vector<16x12xf32>
    %9 = arith.negf %8 : vector<16x12xf32>
    %10 = math.exp %9 : vector<16x12xf32>
    %cst_7 = arith.constant 1.000000e+00 : f32
    %11 = vector.broadcast %cst_7 : f32 to vector<16x12xf32>
    %12 = arith.addf %11, %10 : vector<16x12xf32>
    %13 = arith.divf %11, %12 : vector<16x12xf32>
    %14 = vector.shape_cast %13 : vector<16x12xf32> to vector<16x12x1xf32>
    %15 = vector.broadcast %14 : vector<16x12x1xf32> to vector<16x12x8xf32>
    %16 = arith.mulf %1, %15 : vector<16x12x8xf32>
    %cst_8 = arith.constant dense<0.000000e+00> : vector<16x8xf32>
    %17 = vector.multi_reduction <add>, %16, %cst_8 [1] : vector<16x12x8xf32> to vector<16x8xf32>
    %c0_9 = arith.constant 0 : index
    %c0_10 = arith.constant 0 : index
    %18 = vector.load %arg3[%c0_9, %c0_10] : memref<8x8xf32, #tpu.memory_space<vmem>>, vector<8x8xf32>
    %cst_11 = arith.constant dense<0.000000e+00> : vector<16x8xf32>
    %19 = tpu.matmul %17, %18, %cst_11 {dimension_numbers = #tpu.dot_dimension_numbers<[1], [0], [0], [1], [0, 0, 1, 1], [], []>} : vector<16x8xf32>, vector<8x8xf32>, vector<16x8xf32> -> vector<16x8xf32>
    %20 = vector.broadcast %2 : f32 to vector<16x8xf32>
    %21 = arith.mulf %20, %19 : vector<16x8xf32>
    %22 = arith.addf %0, %21 : vector<16x8xf32>
    %23 = arith.mulf %17, %17 : vector<16x8xf32>
    %cst_12 = arith.constant dense<0.000000e+00> : vector<16xf32>
    %24 = vector.multi_reduction <add>, %23, %cst_12 [1] : vector<16x8xf32> to vector<16xf32>
    %25 = vector.shape_cast %24 : vector<16xf32> to vector<16x1xf32>
    %26 = math.sqrt %25 : vector<16x1xf32>
    %cst_13 = arith.constant 9.99999996E-13 : f32
    %27 = vector.broadcast %cst_13 : f32 to vector<16x1xf32>
    %28 = arith.maximumf %26, %27 : vector<16x1xf32>
    %29 = vector.broadcast %28 : vector<16x1xf32> to vector<16x8xf32>
    %30 = arith.divf %17, %29 : vector<16x8xf32>
    %31 = tpu.concatenate %0, %30, %22 in 1 : vector<16x8xf32>, vector<16x8xf32>, vector<16x8xf32> -> vector<16x24xf32>
    %c0_14 = arith.constant 0 : index
    %c0_15 = arith.constant 0 : index
    %32 = vector.load %arg4[%c0_14, %c0_15] : memref<504x256xf32, #tpu.memory_space<vmem>>, vector<24x256xf32>
    %cst_16 = arith.constant dense<0.000000e+00> : vector<16x256xf32>
    %33 = tpu.matmul %31, %32, %cst_16 {dimension_numbers = #tpu.dot_dimension_numbers<[1], [0], [0], [1], [0, 0, 1, 1], [], []>} : vector<16x24xf32>, vector<24x256xf32>, vector<16x256xf32> -> vector<16x256xf32>
    %c0_17 = arith.constant 0 : index
    %c0_18 = arith.constant 0 : index
    %34 = vector.load %arg5[%c0_17, %c0_18] : memref<13x256xf32, #tpu.memory_space<vmem>>, vector<1x256xf32>
    %35 = vector.broadcast %34 : vector<1x256xf32> to vector<16x256xf32>
    %36 = arith.addf %33, %35 : vector<16x256xf32>
    %cst_19 = arith.constant 0.000000e+00 : f32
    %37 = vector.broadcast %cst_19 : f32 to vector<16x256xf32>
    %38 = arith.maximumf %36, %37 : vector<16x256xf32>
    %cst_20 = arith.constant dense<0.000000e+00> : vector<256xf32>
    %39 = vector.multi_reduction <add>, %38, %cst_20 [0] : vector<16x256xf32> to vector<256xf32>
    %40 = vector.shape_cast %39 : vector<256xf32> to vector<1x256xf32>
    %41 = vector.extract_strided_slice %40 {offsets = [0, 0], sizes = [1, 64], strides = [1, 1]} : vector<1x256xf32> to vector<1x64xf32>
    %42 = vector.extract_strided_slice %40 {offsets = [0, 64], sizes = [1, 64], strides = [1, 1]} : vector<1x256xf32> to vector<1x64xf32>
    %43 = arith.addf %41, %42 : vector<1x64xf32>
    %44 = vector.extract_strided_slice %40 {offsets = [0, 128], sizes = [1, 64], strides = [1, 1]} : vector<1x256xf32> to vector<1x64xf32>
    %45 = arith.addf %43, %44 : vector<1x64xf32>
    %46 = vector.extract_strided_slice %40 {offsets = [0, 192], sizes = [1, 64], strides = [1, 1]} : vector<1x256xf32> to vector<1x64xf32>
    %47 = arith.addf %45, %46 : vector<1x64xf32>
    %cst_21 = arith.constant 6.400000e+01 : f32
    %48 = vector.broadcast %cst_21 : f32 to vector<1x64xf32>
    %49 = arith.divf %47, %48 : vector<1x64xf32>
    %50 = tpu.concatenate %49, %49, %49, %49 in 1 : vector<1x64xf32>, vector<1x64xf32>, vector<1x64xf32>, vector<1x64xf32> -> vector<1x256xf32>
    %51 = vector.broadcast %50 : vector<1x256xf32> to vector<16x256xf32>
    %52 = arith.subf %38, %51 : vector<16x256xf32>
    %53 = arith.mulf %52, %52 : vector<16x256xf32>
    %cst_22 = arith.constant dense<0.000000e+00> : vector<256xf32>
    %54 = vector.multi_reduction <add>, %53, %cst_22 [0] : vector<16x256xf32> to vector<256xf32>
    %55 = vector.shape_cast %54 : vector<256xf32> to vector<1x256xf32>
    %56 = vector.extract_strided_slice %55 {offsets = [0, 0], sizes = [1, 64], strides = [1, 1]} : vector<1x256xf32> to vector<1x64xf32>
    %57 = vector.extract_strided_slice %55 {offsets = [0, 64], sizes = [1, 64], strides = [1, 1]} : vector<1x256xf32> to vector<1x64xf32>
    %58 = arith.addf %56, %57 : vector<1x64xf32>
    %59 = vector.extract_strided_slice %55 {offsets = [0, 128], sizes = [1, 64], strides = [1, 1]} : vector<1x256xf32> to vector<1x64xf32>
    %60 = arith.addf %58, %59 : vector<1x64xf32>
    %61 = vector.extract_strided_slice %55 {offsets = [0, 192], sizes = [1, 64], strides = [1, 1]} : vector<1x256xf32> to vector<1x64xf32>
    %62 = arith.addf %60, %61 : vector<1x64xf32>
    %cst_23 = arith.constant 6.400000e+01 : f32
    %63 = vector.broadcast %cst_23 : f32 to vector<1x64xf32>
    %64 = arith.divf %62, %63 : vector<1x64xf32>
    %cst_24 = arith.constant 9.99999974E-6 : f32
    %65 = vector.broadcast %cst_24 : f32 to vector<1x64xf32>
    %66 = arith.addf %64, %65 : vector<1x64xf32>
    %67 = math.rsqrt %66 : vector<1x64xf32>
    %68 = tpu.concatenate %67, %67, %67, %67 in 1 : vector<1x64xf32>, vector<1x64xf32>, vector<1x64xf32>, vector<1x64xf32> -> vector<1x256xf32>
    %c1 = arith.constant 1 : index
    %c0_25 = arith.constant 0 : index
    %69 = vector.load %arg5[%c1, %c0_25] : memref<13x256xf32, #tpu.memory_space<vmem>>, vector<1x256xf32>
    %70 = vector.broadcast %69 : vector<1x256xf32> to vector<16x256xf32>
    %71 = arith.mulf %70, %52 : vector<16x256xf32>
    %72 = vector.broadcast %68 : vector<1x256xf32> to vector<16x256xf32>
    %73 = arith.mulf %71, %72 : vector<16x256xf32>
    %c2 = arith.constant 2 : index
    %c0_26 = arith.constant 0 : index
    %74 = vector.load %arg5[%c2, %c0_26] : memref<13x256xf32, #tpu.memory_space<vmem>>, vector<1x256xf32>
    %75 = vector.broadcast %74 : vector<1x256xf32> to vector<16x256xf32>
    %76 = arith.addf %73, %75 : vector<16x256xf32>
    %c24 = arith.constant 24 : index
    %c0_27 = arith.constant 0 : index
    %77 = vector.load %arg4[%c24, %c0_27] : memref<504x256xf32, #tpu.memory_space<vmem>>, vector<256x128xf32>
    %c3 = arith.constant 3 : index
    %c0_28 = arith.constant 0 : index
    %78 = vector.load %arg5[%c3, %c0_28] : memref<13x256xf32, #tpu.memory_space<vmem>>, vector<1x128xf32>
    %c4 = arith.constant 4 : index
    %c0_29 = arith.constant 0 : index
    %79 = vector.load %arg5[%c4, %c0_29] : memref<13x256xf32, #tpu.memory_space<vmem>>, vector<1x128xf32>
    %c5 = arith.constant 5 : index
    %c0_30 = arith.constant 0 : index
    %80 = vector.load %arg5[%c5, %c0_30] : memref<13x256xf32, #tpu.memory_space<vmem>>, vector<1x128xf32>
    %cst_31 = arith.constant dense<0.000000e+00> : vector<16x128xf32>
    %81 = tpu.matmul %76, %77, %cst_31 {dimension_numbers = #tpu.dot_dimension_numbers<[1], [0], [0], [1], [0, 0, 1, 1], [], []>} : vector<16x256xf32>, vector<256x128xf32>, vector<16x128xf32> -> vector<16x128xf32>
    %82 = vector.broadcast %78 : vector<1x128xf32> to vector<16x128xf32>
    %83 = arith.addf %81, %82 : vector<16x128xf32>
    %cst_32 = arith.constant dense<0.000000e+00> : vector<128xf32>
    %84 = vector.multi_reduction <add>, %83, %cst_32 [0] : vector<16x128xf32> to vector<128xf32>
    %85 = vector.shape_cast %84 : vector<128xf32> to vector<1x128xf32>
    %cst_33 = arith.constant 1.600000e+01 : f32
    %86 = vector.broadcast %cst_33 : f32 to vector<1x128xf32>
    %87 = arith.divf %85, %86 : vector<1x128xf32>
    %88 = vector.broadcast %87 : vector<1x128xf32> to vector<16x128xf32>
    %89 = arith.subf %83, %88 : vector<16x128xf32>
    %90 = arith.mulf %89, %89 : vector<16x128xf32>
    %cst_34 = arith.constant dense<0.000000e+00> : vector<128xf32>
    %91 = vector.multi_reduction <add>, %90, %cst_34 [0] : vector<16x128xf32> to vector<128xf32>
    %92 = vector.shape_cast %91 : vector<128xf32> to vector<1x128xf32>
    %cst_35 = arith.constant 1.600000e+01 : f32
    %93 = vector.broadcast %cst_35 : f32 to vector<1x128xf32>
    %94 = arith.divf %92, %93 : vector<1x128xf32>
    %95 = vector.broadcast %87 : vector<1x128xf32> to vector<16x128xf32>
    %96 = arith.subf %83, %95 : vector<16x128xf32>
    %97 = vector.broadcast %79 : vector<1x128xf32> to vector<16x128xf32>
    %98 = arith.mulf %97, %96 : vector<16x128xf32>
    %cst_36 = arith.constant 9.99999974E-6 : f32
    %99 = vector.broadcast %cst_36 : f32 to vector<1x128xf32>
    %100 = arith.addf %94, %99 : vector<1x128xf32>
    %101 = math.rsqrt %100 : vector<1x128xf32>
    %102 = vector.broadcast %101 : vector<1x128xf32> to vector<16x128xf32>
    %103 = arith.mulf %98, %102 : vector<16x128xf32>
    %104 = vector.broadcast %80 : vector<1x128xf32> to vector<16x128xf32>
    %105 = arith.addf %103, %104 : vector<16x128xf32>
    %cst_37 = arith.constant 0.000000e+00 : f32
    %106 = vector.broadcast %cst_37 : f32 to vector<16x128xf32>
    %107 = arith.maximumf %105, %106 : vector<16x128xf32>
    %c280 = arith.constant 280 : index
    %c0_38 = arith.constant 0 : index
    %108 = vector.load %arg4[%c280, %c0_38] : memref<504x256xf32, #tpu.memory_space<vmem>>, vector<128x64xf32>
    %c6 = arith.constant 6 : index
    %c0_39 = arith.constant 0 : index
    %109 = vector.load %arg5[%c6, %c0_39] : memref<13x256xf32, #tpu.memory_space<vmem>>, vector<1x64xf32>
    %c7 = arith.constant 7 : index
    %c0_40 = arith.constant 0 : index
    %110 = vector.load %arg5[%c7, %c0_40] : memref<13x256xf32, #tpu.memory_space<vmem>>, vector<1x64xf32>
    %c8 = arith.constant 8 : index
    %c0_41 = arith.constant 0 : index
    %111 = vector.load %arg5[%c8, %c0_41] : memref<13x256xf32, #tpu.memory_space<vmem>>, vector<1x64xf32>
    %cst_42 = arith.constant dense<0.000000e+00> : vector<16x64xf32>
    %112 = tpu.matmul %107, %108, %cst_42 {dimension_numbers = #tpu.dot_dimension_numbers<[1], [0], [0], [1], [0, 0, 1, 1], [], []>} : vector<16x128xf32>, vector<128x64xf32>, vector<16x64xf32> -> vector<16x64xf32>
    %113 = vector.broadcast %109 : vector<1x64xf32> to vector<16x64xf32>
    %114 = arith.addf %112, %113 : vector<16x64xf32>
    %cst_43 = arith.constant dense<0.000000e+00> : vector<64xf32>
    %115 = vector.multi_reduction <add>, %114, %cst_43 [0] : vector<16x64xf32> to vector<64xf32>
    %116 = vector.shape_cast %115 : vector<64xf32> to vector<1x64xf32>
    %cst_44 = arith.constant 1.600000e+01 : f32
    %117 = vector.broadcast %cst_44 : f32 to vector<1x64xf32>
    %118 = arith.divf %116, %117 : vector<1x64xf32>
    %119 = vector.broadcast %118 : vector<1x64xf32> to vector<16x64xf32>
    %120 = arith.subf %114, %119 : vector<16x64xf32>
    %121 = arith.mulf %120, %120 : vector<16x64xf32>
    %cst_45 = arith.constant dense<0.000000e+00> : vector<64xf32>
    %122 = vector.multi_reduction <add>, %121, %cst_45 [0] : vector<16x64xf32> to vector<64xf32>
    %123 = vector.shape_cast %122 : vector<64xf32> to vector<1x64xf32>
    %cst_46 = arith.constant 1.600000e+01 : f32
    %124 = vector.broadcast %cst_46 : f32 to vector<1x64xf32>
    %125 = arith.divf %123, %124 : vector<1x64xf32>
    %126 = vector.broadcast %118 : vector<1x64xf32> to vector<16x64xf32>
    %127 = arith.subf %114, %126 : vector<16x64xf32>
    %128 = vector.broadcast %110 : vector<1x64xf32> to vector<16x64xf32>
    %129 = arith.mulf %128, %127 : vector<16x64xf32>
    %cst_47 = arith.constant 9.99999974E-6 : f32
    %130 = vector.broadcast %cst_47 : f32 to vector<1x64xf32>
    %131 = arith.addf %125, %130 : vector<1x64xf32>
    %132 = math.rsqrt %131 : vector<1x64xf32>
    %133 = vector.broadcast %132 : vector<1x64xf32> to vector<16x64xf32>
    %134 = arith.mulf %129, %133 : vector<16x64xf32>
    %135 = vector.broadcast %111 : vector<1x64xf32> to vector<16x64xf32>
    %136 = arith.addf %134, %135 : vector<16x64xf32>
    %cst_48 = arith.constant 0.000000e+00 : f32
    %137 = vector.broadcast %cst_48 : f32 to vector<16x64xf32>
    %138 = arith.maximumf %136, %137 : vector<16x64xf32>
    %c408 = arith.constant 408 : index
    %c0_49 = arith.constant 0 : index
    %139 = vector.load %arg4[%c408, %c0_49] : memref<504x256xf32, #tpu.memory_space<vmem>>, vector<64x32xf32>
    %c9 = arith.constant 9 : index
    %c0_50 = arith.constant 0 : index
    %140 = vector.load %arg5[%c9, %c0_50] : memref<13x256xf32, #tpu.memory_space<vmem>>, vector<1x32xf32>
    %c10 = arith.constant 10 : index
    %c0_51 = arith.constant 0 : index
    %141 = vector.load %arg5[%c10, %c0_51] : memref<13x256xf32, #tpu.memory_space<vmem>>, vector<1x32xf32>
    %c11 = arith.constant 11 : index
    %c0_52 = arith.constant 0 : index
    %142 = vector.load %arg5[%c11, %c0_52] : memref<13x256xf32, #tpu.memory_space<vmem>>, vector<1x32xf32>
    %cst_53 = arith.constant dense<0.000000e+00> : vector<16x32xf32>
    %143 = tpu.matmul %138, %139, %cst_53 {dimension_numbers = #tpu.dot_dimension_numbers<[1], [0], [0], [1], [0, 0, 1, 1], [], []>} : vector<16x64xf32>, vector<64x32xf32>, vector<16x32xf32> -> vector<16x32xf32>
    %144 = vector.broadcast %140 : vector<1x32xf32> to vector<16x32xf32>
    %145 = arith.addf %143, %144 : vector<16x32xf32>
    %cst_54 = arith.constant dense<0.000000e+00> : vector<32xf32>
    %146 = vector.multi_reduction <add>, %145, %cst_54 [0] : vector<16x32xf32> to vector<32xf32>
    %147 = vector.shape_cast %146 : vector<32xf32> to vector<1x32xf32>
    %cst_55 = arith.constant 1.600000e+01 : f32
    %148 = vector.broadcast %cst_55 : f32 to vector<1x32xf32>
    %149 = arith.divf %147, %148 : vector<1x32xf32>
    %150 = vector.broadcast %149 : vector<1x32xf32> to vector<16x32xf32>
    %151 = arith.subf %145, %150 : vector<16x32xf32>
    %152 = arith.mulf %151, %151 : vector<16x32xf32>
    %cst_56 = arith.constant dense<0.000000e+00> : vector<32xf32>
    %153 = vector.multi_reduction <add>, %152, %cst_56 [0] : vector<16x32xf32> to vector<32xf32>
    %154 = vector.shape_cast %153 : vector<32xf32> to vector<1x32xf32>
    %cst_57 = arith.constant 1.600000e+01 : f32
    %155 = vector.broadcast %cst_57 : f32 to vector<1x32xf32>
    %156 = arith.divf %154, %155 : vector<1x32xf32>
    %157 = vector.broadcast %149 : vector<1x32xf32> to vector<16x32xf32>
    %158 = arith.subf %145, %157 : vector<16x32xf32>
    %159 = vector.broadcast %141 : vector<1x32xf32> to vector<16x32xf32>
    %160 = arith.mulf %159, %158 : vector<16x32xf32>
    %cst_58 = arith.constant 9.99999974E-6 : f32
    %161 = vector.broadcast %cst_58 : f32 to vector<1x32xf32>
    %162 = arith.addf %156, %161 : vector<1x32xf32>
    %163 = math.rsqrt %162 : vector<1x32xf32>
    %164 = vector.broadcast %163 : vector<1x32xf32> to vector<16x32xf32>
    %165 = arith.mulf %160, %164 : vector<16x32xf32>
    %166 = vector.broadcast %142 : vector<1x32xf32> to vector<16x32xf32>
    %167 = arith.addf %165, %166 : vector<16x32xf32>
    %cst_59 = arith.constant 0.000000e+00 : f32
    %168 = vector.broadcast %cst_59 : f32 to vector<16x32xf32>
    %169 = arith.maximumf %167, %168 : vector<16x32xf32>
    %c472 = arith.constant 472 : index
    %c0_60 = arith.constant 0 : index
    %170 = vector.load %arg4[%c472, %c0_60] : memref<504x256xf32, #tpu.memory_space<vmem>>, vector<32x8xf32>
    %cst_61 = arith.constant dense<0.000000e+00> : vector<16x8xf32>
    %171 = tpu.matmul %169, %170, %cst_61 {dimension_numbers = #tpu.dot_dimension_numbers<[1], [0], [0], [1], [0, 0, 1, 1], [], []>} : vector<16x32xf32>, vector<32x8xf32>, vector<16x8xf32> -> vector<16x8xf32>
    %c12 = arith.constant 12 : index
    %c0_62 = arith.constant 0 : index
    %172 = vector.load %arg5[%c12, %c0_62] : memref<13x256xf32, #tpu.memory_space<vmem>>, vector<1x8xf32>
    %173 = vector.broadcast %172 : vector<1x8xf32> to vector<16x8xf32>
    %174 = arith.addf %171, %173 : vector<16x8xf32>
    %175 = arith.addf %22, %174 : vector<16x8xf32>
    %c0_63 = arith.constant 0 : index
    %c0_64 = arith.constant 0 : index
    %176 = vector.load %arg7[%c0_63, %c0_64] : memref<16x8xf32, #tpu.memory_space<vmem>>, vector<16x8xf32>
    tpu.vector_store %arg7[%c0_63, %c0_64], %175 {strides = array<i32>} : memref<16x8xf32, #tpu.memory_space<vmem>>, vector<16x8xf32>,
    return
  }
  func.func @transform_0(%arg0: i32) -> (i32, i32) {
    %c0_i32 = arith.constant 0 : i32
    %c0_i32_0 = arith.constant 0 : i32
    %c0_i32_1 = arith.constant 0 : i32
    return %c0_i32, %c0_i32_0 : i32, i32
  }
  func.func @transform_1(%arg0: i32) -> (i32, i32, i32) {
    %c0_i32 = arith.constant 0 : i32
    %c0_i32_0 = arith.constant 0 : i32
    %c0_i32_1 = arith.constant 0 : i32
    %c0_i32_2 = arith.constant 0 : i32
    return %c0_i32, %c0_i32_0, %c0_i32_1 : i32, i32, i32
  }
  func.func @transform_2(%arg0: i32) -> (i32, i32) {
    %c0_i32 = arith.constant 0 : i32
    %c0_i32_0 = arith.constant 0 : i32
    %c0_i32_1 = arith.constant 0 : i32
    return %c0_i32, %c0_i32_0 : i32, i32
  }
  func.func @transform_3(%arg0: i32) -> (i32, i32) {
    %c0_i32 = arith.constant 0 : i32
    %c0_i32_0 = arith.constant 0 : i32
    %c0_i32_1 = arith.constant 0 : i32
    return %c0_i32, %c0_i32_0 : i32, i32
  }
  func.func @transform_4(%arg0: i32) -> (i32, i32) {
    %c0_i32 = arith.constant 0 : i32
    %c0_i32_0 = arith.constant 0 : i32
    %c0_i32_1 = arith.constant 0 : i32
    return %c0_i32, %c0_i32_0 : i32, i32
  }
  func.func @transform_5(%arg0: i32) -> (i32, i32) {
    %c0_i32 = arith.constant 0 : i32
    %c0_i32_0 = arith.constant 0 : i32
    %c0_i32_1 = arith.constant 0 : i32
    return %c0_i32, %c0_i32_0 : i32, i32
  }
  func.func @transform_6(%arg0: i32) -> (i32, i32) {
    %c0_i32 = arith.constant 0 : i32
    %c0_i32_0 = arith.constant 0 : i32
    %c0_i32_1 = arith.constant 0 : i32
    return %c0_i32, %c0_i32_0 : i32, i32
  }
}

</mosaic_0001>

<bundles_post_ra>
// kernel: tpu_custom_call.1
= control target key start
LH: loop header
LB: loop body
LE: loop exit
PB: predicated region body
PF: predicated region fallthrough
CT: control target
= control target key end

     0   :  { %12 = vsyncpa [#allocation4], 0  ;;  %s2305_s21 = smov [#allocation3]   ;;  %s2993_s0 = inlined_call_operand.vmem [shape: f32[16,8], index: 0, kind: input, shape index: {}]   ;;  %s2994_s1 = inlined_call_operand.vmem [shape: f32[16,12,8], index: 1, kind: input, shape index: {}]   ;;  %s2995_s2 = inlined_call_operand.vmem [shape: f32[8,8], index: 2, kind: input, shape index: {}]   ;;  %s2996_s3 = inlined_call_operand.hbm [shape: f32[504,256], index: 3, kind: input, shape index: {}]   ;;  %s2997_s4 = inlined_call_operand.vmem [shape: f32[13,256], index: 4, kind: input, shape index: {}]   ;;  %s2998_s5 = inlined_call_operand.<no memory space> [shape: f32[1,1], index: 5, kind: input, shape index: {}]   ;;  %s2999_s6 = inlined_call_operand.vmem [shape: f32[16,8], index: 6, kind: output, shape index: {}]  }
   0x1   :  { %s24_s22 = sshll.u32 %s2305_s21, 4  ;;  %s2281_s25 = scalar_lea.hbm %s2996_s3, 16128  ;;  %s25_s22 = int_to_ptr.vmem [resolvable:$true] %s24_s22 }
   0x2   :  { %p2282_p0 = scmp.ne.s32.totalorder %s2996_s3, %s2281_s25  ;;  %p2285_p1 = scmp.lt.u32.totalorder %s2281_s25, %s2996_s3 }
   0x4   :  { %p2287_p2 = pnand %p2285_p1, %p2282_p0 }
   0x6   :  { %2290 = shalt.err (!%p2287_p2)
}
   0x7   :  { %s2291_s30 = scalar_lea.vmem %s25_s22, 16128  ;;  %p2296_p4 = scmp.lt.s32.totalorder %s25_s22, %s25_s22 }
   0x8   :  { %p2292_p3 = scmp.ne.s32.totalorder %s25_s22, %s2291_s30  ;;  %p2297_p5 = scmp.lt.s32.totalorder %s2291_s30, %s2291_s30 }
   0xa   :  { %p2298_p6 = por %p2297_p5, %p2296_p4 }
   0xc   :  { %p2299_p7 = pnand %p2298_p6, %p2292_p3 }
   0xe   :  { %2302 = shalt.err (!%p2299_p7)
}
   0xf   :  { %s2306_s7 = smov 256   ;;  %s2307_s8 = smov 16  }
  0x10   :  { %30 = dma.hbm_to_vmem [thread:$0]  %s2996_s3, 16128, %s25_s22, [#allocation4], %s2306_s7, %s2306_s7, %s2307_s8  }
  0x11   :  { %2303 = dma.done.wait [#allocation4], 16128  }
  0x12   :  { %2304 = vsyncadd [#allocation4], 4294951168  ;;  %v79_v0 = vlaneseq  ;;  %v2308_v1 = vmov 1966171168   ;;  %v2368_v6 = vld [vmem:[%s2993_s0 + $0x8] sm:$0xff]  ;;  %v38_v7 = vld [vmem:[%s2993_s0] sm:$0xff] }
  0x13   :  { %v77_v2 = vunpack.c.l.s4 %v2308_v1  ;;  %v2384_v14 = vld [vmem:[%s2994_s1 + $0x88] sm:$0xf]  ;;  %v2389_v15 = vld [vmem:[%s2994_s1] sm:$0xff]  ;;  %vm289_vm0 = vcmask 60416   ;;  %vm285_vm1 = vcmask 64512   ;;  %v2402_v20 = vld [vmem:[%s2994_s1 + $0x10] sm:$0xff]  ;;  %v75_v42 = vcombine.high %v38_v7, %v38_v7 }
  0x14   :  { %v2360_v3 = vshrl.u32 %v79_v0, 7  ;;  %v2394_v16 = vld [vmem:[%s2994_s1 + $0x8] sm:$0xf]  ;;  %v2411_v27 = vld [vmem:[%s2994_s1 + $0x80] sm:$0xff]  ;;  %v2416_v28 = vld [vmem:[%s2994_s1 + $0x18] sm:$0xf] }
  0x15   :  { %v78_v4 = vunpack.c.0.s8 %v77_v2  ;;  %v2430_v38 = vld [vmem:[%s2994_s1 + $0x20] sm:$0xff]  ;;  %v2435_v39 = vld [vmem:[%s2994_s1 + $0x28] sm:$0xf]  ;;  %v2445_v47 = vld [vmem:[%s2994_s1 + $0x90] sm:$0xff]  ;;  %v124_v2 = vcombine.high %v2368_v6, %v2368_v6  ;;  %vm800_vm2 = vcmask 1041409   ;;  %vm802_vm3 = vcmask 1042434  }
  0x16   :  { %v2376_v9 = vsub.s32 0, %v2360_v3  ;;  %v2450_v48 = vld [vmem:[%s2994_s1 + $0x98] sm:$0xf]  ;;  %v2466_v57 = vld [vmem:[%s2994_s1 + $0x30] sm:$0xff]  ;;  %v2477_v0 = vld [vmem:[%s2994_s1 + $0xa8] sm:$0xf] }
  0x17   :  { %v2363_v5 = vsub.s32 %v78_v4, %v2360_v3  ;;  %v2461_v56 = vld [vmem:[%s2994_s1 + $0x38] sm:$0xf]  ;;  %v2482_v1 = vld [vmem:[%s2994_s1 + $0xa0] sm:$0xff]  ;;  %vm804_vm4 = vcmask 1043459   ;;  %vm806_vm5 = vcmask 1044484   ;;  %vm808_vm6 = vcmask 1045509  }
  0x18   :  { %vm810_vm7 = vcmask 1046534   ;;  %vm812_vm8 = vcmask 1047559   ;;  %vm1099_vm13 = vcmask 130048   ;;  %vm1120_vm14 = vcmask 195584  }
  0x19   :  { %v131_v8 = vrot.slane %v2368_v6, %v2363_v5  ;;  %v82_v10 = vrot.slane %v38_v7, %v2363_v5  ;;  %v89_v51 = vrot.slane %v75_v42, %v2363_v5  ;;  %v2499_v6 = vld [vmem:[%s2994_s1 + $0x40] sm:$0xff]  ;;  %vm1239_vm15 = vcmask 523264  }
  0x1b   :  { %v147_v11 = vrot.slane %v131_v8, %v2363_v5  ;;  %v98_v12 = vrot.slane %v82_v10, %v2363_v5  ;;  %v90_v13 = vcombine.high %v82_v10, %v82_v10  ;;  %v139_v22 = vcombine.high %v131_v8, %v131_v8 }
  0x1c   :  { %v105_v59 = vrot.slane %v89_v51, %v2363_v5  ;;  %v91_v8 = vcombine.high %v89_v51, %v89_v51 }
  0x1d   :  { %v208_v17 = vrot.slane %v147_v11, %v2376_v9  ;;  %v176_v18 = vrot.slane %v98_v12, %v2376_v9  ;;  %v112_v19 = vrot.slane %v90_v13, %v2363_v5  ;;  %v120_v21 = vcombine.high %v98_v12, %v98_v12 }
  0x1e   :  { %v161_v33 = vrot.slane %v139_v22, %v2363_v5  ;;  %v169_v50 = vcombine.high %v147_v11, %v147_v11  ;;  %v192_v12 = vrot.slane %v105_v59, %v2376_v9 }
  0x1f   :  { %v270_v23 = vmul.f32 %v208_v17, %v2384_v14  ;;  %v253_v24 = vmul.f32 %v176_v18, %v2389_v15  ;;  %v254_v25 = vmul.f32 %v176_v18, %v2394_v16  ;;  %v180_v26 = vrot.slane %v112_v19, %v2376_v9 }
  0x20   :  { %v269_v32 = vmul.f32 %v208_v17, %v2411_v27  ;;  %v184_v37 = vrot.slane %v120_v21, %v2376_v9  ;;  %v212_v40 = vrot.slane %v161_v33, %v2376_v9  ;;  %v122_v41 = vcombine.high %v112_v19, %v112_v19  ;;  %v2494_v17 = vld [vmem:[%s2994_s1 + $0x48] sm:$0xf] }
  0x21   :  { %v338_v29 = vsel %vm289_vm0, %v270_v23, 0.0  ;;  %v286_v30 = vsel %vm285_vm1, %v253_v24, 0.0  ;;  %v255_v31 = vmul.f32 %v180_v26, %v2402_v20  ;;  %v290_v34 = vsel %vm289_vm0, %v254_v25, 0.0 }
  0x22   :  { %339 = vadd.xlane.f32.xlu1 %v338_v29  ;;  %287 = vadd.xlane.f32.xlu0 %v286_v30  ;;  %v256_v36 = vmul.f32 %v180_v26, %v2416_v28  ;;  %v335_v43 = vsel %vm285_vm1, %v269_v32, 0.0  ;;  %v257_v45 = vmul.f32 %v184_v37, %v2430_v38  ;;  %v258_v46 = vmul.f32 %v184_v37, %v2435_v39  ;;  %v2511_v26 = vld [vmem:[%s2994_s1 + $0xb8] sm:$0xf]  ;;  %v2516_v29 = vld [vmem:[%s2994_s1 + $0xb0] sm:$0xff] }
  0x23   :  { %v293_v35 = vsel %vm285_vm1, %v255_v31, 0.0  ;;  %v271_v49 = vmul.f32 %v212_v40, %v2445_v47  ;;  %v272_v54 = vmul.f32 %v212_v40, %v2450_v48  ;;  %v188_v55 = vrot.slane %v122_v41, %v2376_v9  ;;  %v2532_v37 = vld [vmem:[%s2994_s1 + $0x50] sm:$0xff] }
  0x24   :  { %v296_v44 = vsel %vm289_vm0, %v256_v36, 0.0  ;;  %v299_v52 = vsel %vm285_vm1, %v257_v45, 0.0  ;;  %v302_v53 = vsel %vm289_vm0, %v258_v46, 0.0  ;;  %v216_v58 = vrot.slane %v169_v50, %v2376_v9  ;;  %v2527_v36 = vld [vmem:[%s2994_s1 + $0x58] sm:$0xf]  ;;  %v2547_v50 = vld [vmem:[%s2994_s1 + $0xc0] sm:$0xff] }
  0x25   :  { %v341_v60 = vsel %vm285_vm1, %v271_v49, 0.0  ;;  %v344_v61 = vsel %vm289_vm0, %v272_v54, 0.0  ;;  %v260_v62 = vmul.f32 %v188_v55, %v2461_v56  ;;  %v259_v63 = vmul.f32 %v188_v55, %v2466_v57  ;;  %v2542_v49 = vld [vmem:[%s2994_s1 + $0xc8] sm:$0xf] }
  0x26   :  { %291 = vadd.xlane.f32.xlu0 %v290_v34  ;;  %294 = vadd.xlane.f32.xlu1 %v293_v35  ;;  %v274_v4 = vmul.f32 %v216_v58, %v2477_v0  ;;  %v273_v7 = vmul.f32 %v216_v58, %v2482_v1  ;;  %v171_v13 = vcombine.high %v161_v33, %v161_v33 }
  0x27   :  { %v308_v10 = vsel %vm289_vm0, %v260_v62, 0.0  ;;  %v305_v11 = vsel %vm285_vm1, %v259_v63, 0.0  ;;  %v119_v19 = vrot.slane %v91_v8, %v2363_v5  ;;  %v138_v21 = vrot.slane %v124_v2, %v2363_v5  ;;  %v2578_v8 = vld [vmem:[%s2994_s1 + $0xd0] sm:$0xff] }
  0x28   :  { %v350_v18 = vsel %vm289_vm0, %v274_v4, 0.0  ;;  %v347_v22 = vsel %vm285_vm1, %v273_v7, 0.0  ;;  %v262_v23 = vmul.f32 %v192_v12, %v2494_v17  ;;  %v261_v24 = vmul.f32 %v192_v12, %v2499_v6  ;;  %v2573_v7 = vld [vmem:[%s2994_s1 + $0xd8] sm:$0xf] }
  0x29   :  { %v220_v25 = vrot.slane %v171_v13, %v2376_v9  ;;  %v196_v30 = vrot.slane %v119_v19, %v2376_v9  ;;  %v154_v31 = vrot.slane %v138_v21, %v2363_v5  ;;  %v121_v41 = vcombine.high %v105_v59, %v105_v59  ;;  %v2558_v59 = vld [vmem:[%s2994_s1 + $0x68] sm:$0xf] }
  0x2a   :  { %336 = vadd.xlane.f32.xlu0 %v335_v43  ;;  %297 = vadd.xlane.f32.xlu1 %v296_v44  ;;  %v314_v32 = vsel %vm289_vm0, %v262_v23, 0.0  ;;  %v311_v33 = vsel %vm285_vm1, %v261_v24, 0.0  ;;  %v140_v42 = vcombine.high %v138_v21, %v138_v21  ;;  %v2593_v21 = vld [vmem:[%s2994_s1 + $0x70] sm:$0xff] }
  0x2b   :  { %v276_v34 = vmul.f32 %v220_v25, %v2511_v26  ;;  %v275_v35 = vmul.f32 %v220_v25, %v2516_v29  ;;  %v264_v40 = vmul.f32 %v196_v30, %v2527_v36  ;;  %v263_v45 = vmul.f32 %v196_v30, %v2532_v37 }
  0x2c   :  { %v224_v46 = vrot.slane %v154_v31, %v2376_v9  ;;  %v200_v51 = vrot.slane %v121_v41, %v2376_v9 }
  0x2d   :  { %v356_v43 = vsel %vm289_vm0, %v276_v34, 0.0  ;;  %v353_v44 = vsel %vm285_vm1, %v275_v35, 0.0  ;;  %v317_v54 = vsel %vm285_vm1, %v263_v45, 0.0  ;;  %v2603_v34 = vld [vmem:[%s2994_s1 + $0xe8] sm:$0xf]  ;;  %v2623_v45 = vld [vmem:[%s2994_s1 + $0xf0] sm:$0xff] }
  0x2e   :  { %300 = vadd.xlane.f32.xlu0 %v299_v52  ;;  %303 = vadd.xlane.f32.xlu1 %v302_v53  ;;  %v168_v52 = vrot.slane %v140_v42, %v2363_v5  ;;  %v320_v53 = vsel %vm289_vm0, %v264_v40, 0.0  ;;  %v278_v55 = vmul.f32 %v224_v46, %v2542_v49  ;;  %v277_v58 = vmul.f32 %v224_v46, %v2547_v50 }
  0x2f   :  { %v266_v5 = vmul.f32 %v200_v51, %v2558_v59 }
  0x30   :  { %v362_v62 = vsel %vm289_vm0, %v278_v55, 0.0  ;;  %v359_v63 = vsel %vm285_vm1, %v277_v58, 0.0  ;;  %v228_v4 = vrot.slane %v168_v52, %v2376_v9  ;;  %v783_v58 = vld [vmem:[%s2995_s2] sm:$0xff]  ;;  %s2309_s2 = smov 8  }
  0x31   :  { %1936 = vmatprep.subr.mxu1 %v783_v58 }
  0x32   :  { %342 = vadd.xlane.f32.xlu0 %v341_v60  ;;  %345 = vadd.xlane.f32.xlu1 %v344_v61  ;;  %v2563_v60 = vld [vmem:[%s2994_s1 + $0x60] sm:$0xff]  ;;  %v123_v61 = vcombine.high %v119_v19, %v119_v19  ;;  %v280_v13 = vmul.f32 %v228_v4, %v2573_v7  ;;  %v2588_v19 = vld [vmem:[%s2994_s1 + $0x78] sm:$0xf] }
  0x33   :  { %v265_v2 = vmul.f32 %v200_v51, %v2563_v60  ;;  %1937 = vmatpush3.msra.mxu1 %v783_v58 }
  0x34   :  { %v368_v25 = vsel %vm289_vm0, %v280_v13, 0.0 }
  0x35   :  { %v323_v12 = vsel %vm285_vm1, %v265_v2, 0.0 }
  0x36   :  { %309 = vadd.xlane.f32.xlu1 %v308_v10  ;;  %306 = vadd.xlane.f32.xlu0 %v305_v11  ;;  %v326_v10 = vsel %vm289_vm0, %v266_v5, 0.0  ;;  %v204_v11 = vrot.slane %v123_v61, %v2376_v9 }
  0x38   :  { %v268_v23 = vmul.f32 %v204_v11, %v2588_v19  ;;  %v267_v24 = vmul.f32 %v204_v11, %v2593_v21 }
  0x3a   :  { %351 = vadd.xlane.f32.xlu1 %v350_v18  ;;  %348 = vadd.xlane.f32.xlu0 %v347_v22  ;;  %v279_v18 = vmul.f32 %v228_v4, %v2578_v8  ;;  %v170_v22 = vcombine.high %v154_v31, %v154_v31  ;;  %v2608_v31 = vld [vmem:[%s2994_s1 + $0xe0] sm:$0xff]  ;;  %v332_v35 = vsel %vm289_vm0, %v268_v23, 0.0  ;;  %v329_v40 = vsel %vm285_vm1, %v267_v24, 0.0 }
  0x3c   :  { %v365_v30 = vsel %vm285_vm1, %v279_v18, 0.0 }
  0x3e   :  { %315 = vadd.xlane.f32.xlu1 %v314_v32  ;;  %312 = vadd.xlane.f32.xlu0 %v311_v33  ;;  %v232_v32 = vrot.slane %v170_v22, %v2376_v9  ;;  %v172_v33 = vcombine.high %v168_v52, %v168_v52 }
  0x40   :  { %v282_v41 = vmul.f32 %v232_v32, %v2603_v34  ;;  %v281_v42 = vmul.f32 %v232_v32, %v2608_v31 }
  0x42   :  { %357 = vadd.xlane.f32.xlu1 %v356_v43  ;;  %354 = vadd.xlane.f32.xlu0 %v353_v44  ;;  %v236_v43 = vrot.slane %v172_v33, %v2376_v9  ;;  %v2618_v44 = vld [vmem:[%s2994_s1 + $0xf8] sm:$0xf]  ;;  %v374_v46 = vsel %vm289_vm0, %v282_v41, 0.0  ;;  %v371_v51 = vsel %vm285_vm1, %v281_v42, 0.0 }
  0x44   :  { %v284_v52 = vmul.f32 %v236_v43, %v2618_v44 }
  0x46   :  { %321 = vadd.xlane.f32.xlu1 %v320_v53  ;;  %318 = vadd.xlane.f32.xlu0 %v317_v54  ;;  %v283_v53 = vmul.f32 %v236_v43, %v2623_v45  ;;  %v380_v54 = vsel %vm289_vm0, %v284_v52, 0.0 }
  0x48   :  { %v377_v55 = vsel %vm285_vm1, %v283_v53, 0.0 }
  0x4a   :  { %363 = vadd.xlane.f32.xlu1 %v362_v62  ;;  %360 = vadd.xlane.f32.xlu0 %v359_v63 }
  0x4e   :  { %327 = vadd.xlane.f32.xlu1 %v326_v10  ;;  %324 = vadd.xlane.f32.xlu0 %v323_v12 }
  0x52   :  { %369 = vadd.xlane.f32.xlu1 %v368_v25  ;;  %366 = vadd.xlane.f32.xlu0 %v365_v30 }
  0x56   :  { %333 = vadd.xlane.f32.xlu1 %v332_v35  ;;  %330 = vadd.xlane.f32.xlu0 %v329_v40 }
  0x5a   :  { %375 = vadd.xlane.f32.xlu1 %v374_v46  ;;  %372 = vadd.xlane.f32.xlu0 %v371_v51 }
  0x5e   :  { %381 = vadd.xlane.f32.xlu1 %v380_v54  ;;  %378 = vadd.xlane.f32.xlu0 %v377_v55 }
  0xaf   :  { %v340_v5 = vpop.xlane.xlu1 %339  ;;  %v288_v61 = vpop.xlane.xlu0 %287 }
  0xb0   :  { %v400_v62 = vsub.f32 0.0, %v340_v5  ;;  %v383_v63 = vsub.f32 0.0, %v288_v61 }
  0xb2   :  { %v1836_v2 = vmul.f32 -1.442695, %v400_v62  ;;  %v1819_v4 = vmul.f32 -1.442695, %v383_v63 }
  0xb3   :  { %v292_v10 = vpop.xlane.xlu0 %291  ;;  %v295_v11 = vpop.xlane.xlu1 %294 }
  0xb4   :  { %2107 = vpow2.f32 %v1836_v2  ;;  %v384_v12 = vsub.f32 0.0, %v292_v10  ;;  %v385_v13 = vsub.f32 0.0, %v295_v11 }
  0xb5   :  { %2109 = vpow2.f32 %v1819_v4 }
  0xb6   :  { %v1820_v18 = vmul.f32 -1.442695, %v384_v12  ;;  %v1821_v22 = vmul.f32 -1.442695, %v385_v13 }
  0xb7   :  { %v337_v23 = vpop.xlane.xlu0 %336  ;;  %v298_v24 = vpop.xlane.xlu1 %297 }
  0xb8   :  { %2111 = vpow2.f32 %v1820_v18  ;;  %v399_v25 = vsub.f32 0.0, %v337_v23  ;;  %v386_v30 = vsub.f32 0.0, %v298_v24 }
  0xb9   :  { %2113 = vpow2.f32 %v1821_v22 }
  0xba   :  { %v1835_v32 = vmul.f32 -1.442695, %v399_v25  ;;  %v1822_v33 = vmul.f32 -1.442695, %v386_v30 }
  0xbb   :  { %v301_v35 = vpop.xlane.xlu0 %300  ;;  %v304_v40 = vpop.xlane.xlu1 %303 }
  0xbc   :  { %2115 = vpow2.f32 %v1835_v32  ;;  %v387_v41 = vsub.f32 0.0, %v301_v35  ;;  %v388_v42 = vsub.f32 0.0, %v304_v40 }
  0xbd   :  { %2117 = vpow2.f32 %v1822_v33 }
  0xbe   :  { %v2108_v43 = vpop.eup %2107  ;;  %v1823_v46 = vmul.f32 -1.442695, %v387_v41  ;;  %v1824_v53 = vmul.f32 -1.442695, %v388_v42 }
  0xbf   :  { %v2110_v51 = vpop.eup %2109  ;;  %v528_v52 = vadd.f32 1.0, %v2108_v43  ;;  %v343_v54 = vpop.xlane.xlu0 %342 }
  0xc0   :  { %v346_v55 = vpop.xlane.xlu1 %345  ;;  %v511_v58 = vadd.f32 1.0, %v2110_v51  ;;  %2119 = vpow2.f32 %v1823_v46  ;;  %v401_v5 = vsub.f32 0.0, %v343_v54 }
  0xc1   :  { %v402_v61 = vsub.f32 0.0, %v346_v55  ;;  %2121 = vrcp.f32 %v528_v52 }
  0xc2   :  { %v2112_v62 = vpop.eup %2111  ;;  %2123 = vrcp.f32 %v511_v58  ;;  %v1837_v63 = vmul.f32 -1.442695, %v401_v5 }
  0xc3   :  { %v2114_v2 = vpop.eup %2113  ;;  %v512_v4 = vadd.f32 1.0, %v2112_v62  ;;  %2125 = vpow2.f32 %v1824_v53  ;;  %v1838_v10 = vmul.f32 -1.442695, %v402_v61  ;;  %v307_v12 = vpop.xlane.xlu0 %306 }
  0xc4   :  { %v310_v11 = vpop.xlane.xlu1 %309  ;;  %v513_v13 = vadd.f32 1.0, %v2114_v2  ;;  %2127 = vpow2.f32 %v1837_v63  ;;  %v389_v22 = vsub.f32 0.0, %v307_v12 }
  0xc5   :  { %v390_v18 = vsub.f32 0.0, %v310_v11  ;;  %2129 = vrcp.f32 %v512_v4 }
  0xc6   :  { %v2116_v23 = vpop.eup %2115  ;;  %2131 = vrcp.f32 %v513_v13  ;;  %v1825_v32 = vmul.f32 -1.442695, %v389_v22 }
  0xc7   :  { %v1826_v24 = vmul.f32 -1.442695, %v390_v18  ;;  %v2118_v25 = vpop.eup %2117  ;;  %v527_v30 = vadd.f32 1.0, %v2116_v23  ;;  %2133 = vpow2.f32 %v1838_v10  ;;  %v349_v35 = vpop.xlane.xlu0 %348 }
  0xc8   :  { %v352_v33 = vpop.xlane.xlu1 %351  ;;  %v514_v40 = vadd.f32 1.0, %v2118_v25  ;;  %v403_v42 = vsub.f32 0.0, %v349_v35 }
  0xc9   :  { %2135 = vpow2.f32 %v1826_v24  ;;  %v404_v41 = vsub.f32 0.0, %v352_v33 }
  0xca   :  { %2137 = vrcp.f32 %v527_v30  ;;  %v2120_v43 = vpop.eup %2119  ;;  %v1839_v51 = vmul.f32 -1.442695, %v403_v42 }
  0xcb   :  { %2139 = vrcp.f32 %v514_v40  ;;  %v1840_v46 = vmul.f32 -1.442695, %v404_v41  ;;  %v2122_v52 = vpop.eup %2121  ;;  %v515_v53 = vadd.f32 1.0, %v2120_v43  ;;  %v313_v55 = vpop.xlane.xlu0 %312 }
  0xcc   :  { %2141 = vpow2.f32 %v1825_v32  ;;  %v316_v54 = vpop.xlane.xlu1 %315  ;;  %v2124_v58 = vpop.eup %2123  ;;  %v391_v61 = vsub.f32 0.0, %v313_v55  ;;  %v624_v25 = vmul.f32 %v2122_v52, %v2384_v14 }
  0xcd   :  { %2143 = vpow2.f32 %v1840_v46  ;;  %v392_v5 = vsub.f32 0.0, %v316_v54  ;;  %v2126_v62 = vpop.eup %2125  ;;  %v607_v30 = vmul.f32 %v2124_v58, %v2389_v15 }
  0xce   :  { %v2128_v63 = vpop.eup %2127  ;;  %v516_v2 = vadd.f32 1.0, %v2126_v62  ;;  %2145 = vpow2.f32 %v1839_v51  ;;  %v1827_v12 = vmul.f32 -1.442695, %v391_v61  ;;  %v712_v15 = vsel %vm289_vm0, %v624_v25, 0.0 }
  0xcf   :  { %v1828_v4 = vmul.f32 -1.442695, %v392_v5  ;;  %v2130_v10 = vpop.eup %2129  ;;  %2147 = vrcp.f32 %v515_v53  ;;  %v529_v11 = vadd.f32 1.0, %v2128_v63  ;;  %v355_v18 = vpop.xlane.xlu0 %354  ;;  %v639_v61 = vsel %vm285_vm1, %v607_v30, 0.0 }
  0xd0   :  { %v358_v13 = vpop.xlane.xlu1 %357  ;;  %v2132_v22 = vpop.eup %2131  ;;  %2149 = vrcp.f32 %v516_v2  ;;  %v608_v32 = vmul.f32 %v2130_v10, %v2394_v16  ;;  %v405_v41 = vsub.f32 0.0, %v355_v18 }
  0xd1   :  { %v406_v23 = vsub.f32 0.0, %v358_v13  ;;  %v2134_v24 = vpop.eup %2133  ;;  %2151 = vrcp.f32 %v529_v11  ;;  %v609_v2 = vmul.f32 %v2132_v22, %v2402_v20 }
  0xd2   :  { %v530_v35 = vadd.f32 1.0, %v2134_v24  ;;  %2153 = vpow2.f32 %v1828_v4  ;;  %v640_v16 = vsel %vm289_vm0, %v608_v32, 0.0  ;;  %v1841_v63 = vmul.f32 -1.442695, %v405_v41 }
  0xd3   :  { %v2136_v33 = vpop.eup %2135  ;;  %v1842_v40 = vmul.f32 -1.442695, %v406_v23  ;;  %2155 = vpow2.f32 %v1827_v12  ;;  %v319_v51 = vpop.xlane.xlu0 %318  ;;  %v641_v13 = vadd.f32 %v640_v16, %v639_v61 }
  0xd4   :  { %v2138_v42 = vpop.eup %2137  ;;  %v518_v43 = vadd.f32 1.0, %v2136_v33  ;;  %v322_v46 = vpop.xlane.xlu1 %321  ;;  %2157 = vrcp.f32 %v530_v35  ;;  %v393_v58 = vsub.f32 0.0, %v319_v51  ;;  %v648_v35 = vsel %vm285_vm1, %v609_v2, 0.0 }
  0xd5   :  { %v2140_v53 = vpop.eup %2139  ;;  %v623_v54 = vmul.f32 %v2138_v42, %v2411_v27  ;;  %v394_v14 = vsub.f32 0.0, %v322_v46  ;;  %2159 = vpow2.f32 %v1842_v40 }
  0xd6   :  { %v2142_v52 = vpop.eup %2141  ;;  %v610_v55 = vmul.f32 %v2140_v53, %v2416_v28  ;;  %2161 = vrcp.f32 %v518_v43  ;;  %v1829_v25 = vmul.f32 -1.442695, %v393_v58 }
  0xd7   :  { %v2144_v5 = vpop.eup %2143  ;;  %v517_v62 = vadd.f32 1.0, %v2142_v52  ;;  %v711_v27 = vsel %vm285_vm1, %v623_v54, 0.0  ;;  %v361_v11 = vpop.xlane.xlu0 %360  ;;  %v1830_v28 = vmul.f32 -1.442695, %v394_v14  ;;  %v642_v54 = vrot.slane %v641_v13, 4 }
  0xd8   :  { %v532_v4 = vadd.f32 1.0, %v2144_v5  ;;  %v364_v10 = vpop.xlane.xlu1 %363  ;;  %v2146_v12 = vpop.eup %2145  ;;  %v649_v18 = vsel %vm289_vm0, %v610_v55, 0.0  ;;  %v713_v33 = vadd.f32 %v712_v15, %v711_v27  ;;  %v407_v20 = vsub.f32 0.0, %v361_v11 }
  0xd9   :  { %2163 = vrcp.f32 %v517_v62  ;;  %v2148_v23 = vpop.eup %2147  ;;  %v531_v24 = vadd.f32 1.0, %v2146_v12  ;;  %v408_v30 = vsub.f32 0.0, %v364_v10  ;;  %v650_v46 = vadd.f32 %v649_v18, %v648_v35 }
  0xda   :  { %2165 = vrcp.f32 %v532_v4  ;;  %v2150_v32 = vpop.eup %2149  ;;  %v1843_v52 = vmul.f32 -1.442695, %v407_v20  ;;  %v714_v16 = vrot.slane %v713_v33, 4  ;;  %v611_v55 = vmul.f32 %v2148_v23, %v2430_v38 }
  0xdb   :  { %2167 = vpow2.f32 %v1841_v63  ;;  %v2152_v22 = vpop.eup %2151  ;;  %v1844_v40 = vmul.f32 -1.442695, %v408_v30  ;;  %v325_v42 = vpop.xlane.xlu0 %324  ;;  %v612_v5 = vmul.f32 %v2150_v32, %v2435_v39  ;;  %v651_v27 = vrot.slane %v650_v46, 4 }
  0xdc   :  { %2169 = vrcp.f32 %v531_v24  ;;  %v328_v41 = vpop.xlane.xlu1 %327  ;;  %v2154_v43 = vpop.eup %2153  ;;  %v625_v51 = vmul.f32 %v2152_v22, %v2445_v47  ;;  %v395_v10 = vsub.f32 0.0, %v325_v42  ;;  %v2652_v39 = vadd.f32 %v642_v54, %v641_v13 }
  0xdd   :  { %2171 = vpow2.f32 %v1830_v28  ;;  %v2156_v53 = vpop.eup %2155  ;;  %v520_v14 = vadd.f32 1.0, %v2154_v43  ;;  %v396_v62 = vsub.f32 0.0, %v328_v41  ;;  %v657_v30 = vsel %vm285_vm1, %v611_v55, 0.0 }
  0xde   :  { %2173 = vpow2.f32 %v1829_v25  ;;  %v2158_v15 = vpop.eup %2157  ;;  %v519_v58 = vadd.f32 1.0, %v2156_v53  ;;  %v720_v4 = vsel %vm285_vm1, %v625_v51, 0.0  ;;  %v2654_v25 = vadd.f32 %v714_v16, %v713_v33 }
  0xdf   :  { %2175 = vpow2.f32 %v1844_v40  ;;  %v626_v61 = vmul.f32 %v2158_v15, %v2450_v48  ;;  %v367_v47 = vpop.xlane.xlu0 %366  ;;  %v2160_v2 = vpop.eup %2159  ;;  %v1832_v18 = vmul.f32 -1.442695, %v396_v62  ;;  %v1831_v48 = vmul.f32 -1.442695, %v395_v10 }
  0xe0   :  { %2177 = vrcp.f32 %v520_v14  ;;  %v370_v63 = vpop.xlane.xlu1 %369  ;;  %v2162_v11 = vpop.eup %2161  ;;  %v534_v38 = vadd.f32 1.0, %v2160_v2  ;;  %v658_v32 = vsel %vm289_vm0, %v612_v5, 0.0  ;;  %v409_v42 = vsub.f32 0.0, %v367_v47 }
  0xe1   :  { %2179 = vrcp.f32 %v519_v58  ;;  %v721_v12 = vsel %vm289_vm0, %v626_v61, 0.0  ;;  %v410_v23 = vsub.f32 0.0, %v370_v63  ;;  %v2658_v13 = vadd.f32 %v651_v27, %v650_v46 }
  0xe2   :  { %2181 = vpow2.f32 %v1843_v52  ;;  %v722_v40 = vadd.f32 %v721_v12, %v720_v4  ;;  %v614_v51 = vmul.f32 %v2162_v11, %v2461_v56  ;;  %v2661_v54 = vadd.f32 %v658_v32, %v657_v30 }
  0xe3   :  { %v2164_v28 = vpop.eup %2163  ;;  %2183 = vrcp.f32 %v534_v38  ;;  %v331_v22 = vpop.xlane.xlu0 %330  ;;  %v1846_v41 = vmul.f32 -1.442695, %v410_v23  ;;  %v1845_v47 = vmul.f32 -1.442695, %v409_v42 }
  0xe4   :  { %v2166_v24 = vpop.eup %2165  ;;  %v334_v20 = vpop.xlane.xlu1 %333  ;;  %2185 = vpow2.f32 %v1832_v18  ;;  %v613_v14 = vmul.f32 %v2164_v28, %v2466_v57  ;;  %v397_v5 = vsub.f32 0.0, %v331_v22  ;;  %v723_v56 = vrot.slane %v722_v40, 4 }
  0xe5   :  { %v2168_v35 = vpop.eup %2167  ;;  %2187 = vpow2.f32 %v1831_v48  ;;  %v628_v52 = vmul.f32 %v2166_v24, %v2477_v0  ;;  %v398_v58 = vsub.f32 0.0, %v334_v20  ;;  %v667_v27 = vsel %vm289_vm0, %v614_v51, 0.0 }
  0xe6   :  { %v2170_v43 = vpop.eup %2169  ;;  %v533_v53 = vadd.f32 1.0, %v2168_v35  ;;  %v660_v38 = vrot.slane %v2661_v54, 4  ;;  %v1833_v18 = vmul.f32 -1.442695, %v397_v5  ;;  %v724_v23 = vadd.f32 %v723_v56, %v722_v40 }
  0xe7   :  { %v2172_v33 = vpop.eup %2171  ;;  %v627_v15 = vmul.f32 %v2170_v43, %v2482_v1  ;;  %v373_v61 = vpop.xlane.xlu0 %372  ;;  %v1834_v0 = vmul.f32 -1.442695, %v398_v58  ;;  %v666_v1 = vsel %vm285_vm1, %v613_v14, 0.0  ;;  %v730_v10 = vsel %vm289_vm0, %v628_v52, 0.0 }
  0xe8   :  { %v2174_v16 = vpop.eup %2173  ;;  %2189 = vrcp.f32 %v533_v53  ;;  %v522_v55 = vadd.f32 1.0, %v2172_v33  ;;  %v376_v46 = vpop.xlane.xlu1 %375  ;;  %v411_v30 = vsub.f32 0.0, %v373_v61  ;;  %v668_v22 = vadd.f32 %v667_v27, %v666_v1 }
  0xe9   :  { %v2176_v62 = vpop.eup %2175  ;;  %v521_v63 = vadd.f32 1.0, %v2174_v16  ;;  %2191 = vpow2.f32 %v1846_v41  ;;  %v729_v11 = vsel %vm285_vm1, %v627_v15, 0.0  ;;  %v412_v28 = vsub.f32 0.0, %v376_v46 }
  0xea   :  { %v2178_v2 = vpop.eup %2177  ;;  %2193 = vrcp.f32 %v522_v55  ;;  %v536_v57 = vadd.f32 1.0, %v2176_v62  ;;  %v731_v35 = vadd.f32 %v730_v10, %v729_v11  ;;  %v1847_v40 = vmul.f32 -1.442695, %v411_v30 }
  0xeb   :  { %v2180_v4 = vpop.eup %2179  ;;  %2195 = vrcp.f32 %v521_v63  ;;  %v379_v32 = vpop.xlane.xlu0 %378  ;;  %v1848_v41 = vmul.f32 -1.442695, %v412_v28  ;;  %v616_v43 = vmul.f32 %v2178_v2, %v2494_v17  ;;  %v716_v15 = vrot.slane %v2654_v25, 2 }
  0xec   :  { %v2182_v12 = vpop.eup %2181  ;;  %2197 = vrcp.f32 %v536_v57  ;;  %v382_v48 = vpop.xlane.xlu1 %381  ;;  %v615_v51 = vmul.f32 %v2180_v4, %v2499_v6  ;;  %v413_v52 = vsub.f32 0.0, %v379_v32  ;;  %v725_v5 = vrot.slane %v724_v23, 2 }
  0xed   :  { %v535_v24 = vadd.f32 1.0, %v2182_v12  ;;  %2199 = vpow2.f32 %v1845_v47  ;;  %v2184_v20 = vpop.eup %2183  ;;  %v414_v53 = vsub.f32 0.0, %v382_v48  ;;  %v732_v46 = vrot.slane %v731_v35, 4 }
  0xee   :  { %2201 = vpow2.f32 %v1834_v0  ;;  %v2186_v42 = vpop.eup %2185  ;;  %v644_v17 = vrot.slane %v2652_v39, 2  ;;  %v630_v6 = vmul.f32 %v2184_v20, %v2511_v26  ;;  %v1849_v62 = vmul.f32 -1.442695, %v413_v52 }
  0xef   :  { %2203 = vrcp.f32 %v535_v24  ;;  %v2188_v33 = vpop.eup %2187  ;;  %v524_v14 = vadd.f32 1.0, %v2186_v42  ;;  %v1850_v55 = vmul.f32 -1.442695, %v414_v53  ;;  %v661_v56 = vadd.f32 %v660_v38, %v2661_v54 }
  0xf0   :  { %2205 = vpow2.f32 %v1833_v18  ;;  %v523_v16 = vadd.f32 1.0, %v2188_v33  ;;  %v676_v47 = vsel %vm289_vm0, %v616_v43, 0.0  ;;  %v675_v2 = vsel %vm285_vm1, %v615_v51, 0.0 }
  0xf1   :  { %2207 = vpow2.f32 %v1848_v41  ;;  %v669_v27 = vrot.slane %v668_v22, 4  ;;  %v653_v1 = vrot.slane %v2658_v13, 2  ;;  %v2682_v26 = vadd.f32 %v716_v15, %v2654_v25 }
  0xf2   :  { %v2190_v58 = vpop.eup %2189  ;;  %2209 = vrcp.f32 %v524_v14  ;;  %v2684_v11 = vadd.f32 %v725_v5, %v724_v23  ;;  %v662_v54 = vrot.slane %v661_v56, 2  ;;  %v2686_v38 = vadd.f32 %v732_v46, %v731_v35 }
  0xf3   :  { %v2192_v61 = vpop.eup %2191  ;;  %2211 = vrcp.f32 %v523_v16  ;;  %v629_v0 = vmul.f32 %v2190_v58, %v2516_v29  ;;  %v739_v18 = vsel %vm289_vm0, %v630_v6, 0.0  ;;  %v2690_v28 = vadd.f32 %v644_v17, %v2652_v39 }
  0xf4   :  { %v2194_v63 = vpop.eup %2193  ;;  %2213 = vpow2.f32 %v1847_v40  ;;  %v538_v4 = vadd.f32 1.0, %v2192_v61  ;;  %v670_v30 = vadd.f32 %v669_v27, %v668_v22  ;;  %v677_v32 = vadd.f32 %v676_v47, %v675_v2 }
  0xf5   :  { %v2196_v57 = vpop.eup %2195  ;;  %2215 = vpow2.f32 %v1850_v55  ;;  %v738_v23 = vsel %vm285_vm1, %v629_v0, 0.0  ;;  %v654_v35 = vadd.f32 %v653_v1, %v2658_v13  ;;  %v618_v42 = vmul.f32 %v2194_v63, %v2527_v36 }
  0xf6   :  { %v2198_v10 = vpop.eup %2197  ;;  %2217 = vpow2.f32 %v1849_v62  ;;  %v617_v48 = vmul.f32 %v2196_v57, %v2532_v37  ;;  %v663_v43 = vadd.f32 %v662_v54, %v661_v56  ;;  %v671_v39 = vrot.slane %v670_v30, 2 }
  0xf7   :  { %v2200_v12 = vpop.eup %2199  ;;  %2219 = vrcp.f32 %v538_v4  ;;  %v646_v37 = vrot.slane %v2690_v28, 1  ;;  %v678_v22 = vrot.slane %v677_v32, 4  ;;  %v740_v14 = vadd.f32 %v739_v18, %v738_v23 }
  0xf8   :  { %v2202_v29 = vpop.eup %2201  ;;  %v537_v24 = vadd.f32 1.0, %v2200_v12  ;;  %v632_v40 = vmul.f32 %v2198_v10, %v2542_v49  ;;  %v684_v15 = vsel %vm285_vm1, %v617_v48, 0.0  ;;  %v672_v36 = vadd.f32 %v671_v39, %v670_v30 }
  0xf9   :  { %v2204_v25 = vpop.eup %2203  ;;  %v526_v20 = vadd.f32 1.0, %v2202_v29  ;;  %v679_v55 = vadd.f32 %v678_v22, %v677_v32  ;;  %v655_v46 = vrot.slane %v654_v35, 1  ;;  %v664_v17 = vrot.slane %v663_v43, 1 }
  0xfa   :  { %v2206_v41 = vpop.eup %2205  ;;  %2221 = vrcp.f32 %v537_v24  ;;  %v685_v61 = vsel %vm289_vm0, %v618_v42, 0.0  ;;  %v741_v47 = vrot.slane %v740_v14, 4  ;;  %v631_v4 = vmul.f32 %v2204_v25, %v2547_v50 }
  0xfb   :  { %v2208_v51 = vpop.eup %2207  ;;  %2223 = vrcp.f32 %v526_v20  ;;  %v525_v53 = vadd.f32 1.0, %v2206_v41  ;;  %v680_v49 = vrot.slane %v679_v55, 2  ;;  %v686_v56 = vadd.f32 %v685_v61, %v684_v15 }
  0xfc   :  { %v2210_v33 = vpop.eup %2209  ;;  %v540_v52 = vadd.f32 1.0, %v2208_v51  ;;  %v2705_v10 = vadd.f32 %v655_v46, %v654_v35  ;;  %v2707_v18 = vadd.f32 %v664_v17, %v663_v43  ;;  %v734_v30 = vrot.slane %v2686_v38, 2 }
  0xfd   :  { %v2212_v13 = vpop.eup %2211  ;;  %v620_v16 = vmul.f32 %v2210_v33, %v2558_v59  ;;  %2225 = vrcp.f32 %v525_v53  ;;  %v681_v57 = vadd.f32 %v680_v49, %v679_v55  ;;  %v687_v0 = vrot.slane %v686_v56, 4 }
  0xfe   :  { %v2214_v58 = vpop.eup %2213  ;;  %v619_v5 = vmul.f32 %v2212_v13, %v2563_v60  ;;  %2227 = vrcp.f32 %v540_v52  ;;  %v673_v60 = vrot.slane %v672_v36, 1  ;;  %v2711_v32 = vadd.f32 %v646_v37, %v2690_v28 }
  0xff   :  { %v2216_v6 = vpop.eup %2215  ;;  %v539_v62 = vadd.f32 1.0, %v2214_v58  ;;  %v694_v63 = vsel %vm289_vm0, %v620_v16, 0.0  ;;  %v682_v29 = vrot.slane %v681_v57, 1  ;;  %v688_v48 = vadd.f32 %v687_v0, %v686_v56 }
 0x100   :  { %v542_v59 = vadd.f32 1.0, %v2216_v6  ;;  %v693_v2 = vsel %vm285_vm1, %v619_v5, 0.0  ;;  %v2218_v27 = vpop.eup %2217  ;;  %v742_v50 = vadd.f32 %v741_v47, %v740_v14  ;;  %v748_v25 = vsel %vm289_vm0, %v632_v40, 0.0 }
 0x101   :  { %2229 = vrcp.f32 %v539_v62  ;;  %v541_v1 = vadd.f32 1.0, %v2218_v27  ;;  %v695_v54 = vadd.f32 %v694_v63, %v693_v2  ;;  %v2220_v12 = vpop.eup %2219  ;;  %v2714_v35 = vadd.f32 %v673_v60, %v672_v36 }
 0x102   :  { %2231 = vrcp.f32 %v542_v59  ;;  %v689_v41 = vrot.slane %v688_v48, 2  ;;  %v747_v42 = vsel %vm285_vm1, %v631_v4, 0.0  ;;  %v634_v43 = vmul.f32 %v2220_v12, %v2573_v7 }
 0x103   :  { %2233 = vrcp.f32 %v541_v1  ;;  %v696_v23 = vrot.slane %v695_v54, 4  ;;  %v2720_v28 = vadd.f32 %v682_v29, %v681_v57  ;;  %v906_v37 = vmul.f32 %v2705_v10, %v2705_v10 }
 0x104   :  { %v2222_v24 = vpop.eup %2221  ;;  %v907_v33 = vmul.f32 %v2707_v18, %v2707_v18  ;;  %v690_v40 = vadd.f32 %v689_v41, %v688_v48  ;;  %v749_v15 = vadd.f32 %v748_v25, %v747_v42  ;;  %v908_v13 = vmul.f32 %v2714_v35, %v2714_v35 }
 0x105   :  { %v2224_v20 = vpop.eup %2223  ;;  %v697_v51 = vadd.f32 %v696_v23, %v695_v54  ;;  %v633_v22 = vmul.f32 %v2222_v24, %v2578_v8  ;;  %v905_v8 = vmul.f32 %v2711_v32, %v2711_v32  ;;  %v757_v36 = vsel %vm289_vm0, %v634_v43, 0.0 }
 0x106   :  { %v622_v39 = vmul.f32 %v2224_v20, %v2588_v19  ;;  %v801_v19 = vsel %vm800_vm2, %v2705_v10, %v2711_v32  ;;  %v909_v61 = vmul.f32 %v2720_v28, %v2720_v28  ;;  %v691_v49 = vrot.slane %v690_v40, 1 }
 0x107   :  { %v2226_v53 = vpop.eup %2225  ;;  %v698_v52 = vrot.slane %v697_v51, 2  ;;  %v803_v58 = vsel %vm802_vm3, %v2707_v18, %v801_v19  ;;  %v937_v6 = vsel %vm800_vm2, %v906_v37, %v905_v8  ;;  %v756_v62 = vsel %vm285_vm1, %v633_v22, 0.0 }
 0x108   :  { %v621_v14 = vmul.f32 %v2226_v53, %v2593_v21  ;;  %v703_v7 = vsel %vm289_vm0, %v622_v39, 0.0  ;;  %v2228_v16 = vpop.eup %2227  ;;  %v805_v17 = vsel %vm804_vm4, %v2714_v35, %v803_v58  ;;  %v938_v63 = vsel %vm802_vm3, %v907_v33, %v937_v6 }
 0x109   :  { %v699_v55 = vadd.f32 %v698_v52, %v697_v51  ;;  %v807_v56 = vsel %vm806_vm5, %v2720_v28, %v805_v17  ;;  %v636_v59 = vmul.f32 %v2228_v16, %v2603_v34  ;;  %v939_v60 = vsel %vm804_vm4, %v908_v13, %v938_v63 }
 0x10a   :  { %v702_v21 = vsel %vm285_vm1, %v621_v14, 0.0  ;;  %v718_v4 = vrot.slane %v2682_v26, 1  ;;  %v743_v1 = vrot.slane %v742_v50, 2  ;;  %v750_v54 = vrot.slane %v749_v15, 4 }
 0x10b   :  { %v2230_v5 = vpop.eup %2229  ;;  %v704_v46 = vadd.f32 %v703_v7, %v702_v21  ;;  %v700_v0 = vrot.slane %v699_v55, 1  ;;  %v940_v48 = vsel %vm806_vm5, %v909_v61, %v939_v60  ;;  %v758_v24 = vadd.f32 %v757_v36, %v756_v62 }
 0x10c   :  { %v2232_v47 = vpop.eup %2231  ;;  %v635_v2 = vmul.f32 %v2230_v5, %v2608_v31  ;;  %v2755_v31 = vadd.f32 %v691_v49, %v690_v40  ;;  %v727_v23 = vrot.slane %v2684_v11, 1  ;;  %v735_v20 = vadd.f32 %v734_v30, %v2686_v38 }
 0x10d   :  { %v705_v27 = vrot.slane %v704_v46, 4  ;;  %v2234_v57 = vpop.eup %2233  ;;  %v638_v34 = vmul.f32 %v2232_v47, %v2618_v44  ;;  %v751_v41 = vadd.f32 %v750_v54, %v749_v15  ;;  %v759_v42 = vrot.slane %v758_v24, 4 }
 0x10e   :  { %v637_v12 = vmul.f32 %v2234_v57, %v2623_v45  ;;  %v765_v43 = vsel %vm285_vm1, %v635_v2, 0.0  ;;  %v2760_v39 = vadd.f32 %v700_v0, %v699_v55  ;;  %v744_v45 = vadd.f32 %v743_v1, %v742_v50 }
 0x10f   :  { %v706_v29 = vadd.f32 %v705_v27, %v704_v46  ;;  %v766_v51 = vsel %vm289_vm0, %v636_v59, 0.0  ;;  %v752_v44 = vrot.slane %v751_v41, 2  ;;  %v760_v37 = vadd.f32 %v759_v42, %v758_v24 }
 0x110   :  { %v774_v53 = vsel %vm285_vm1, %v637_v12, 0.0  ;;  %v767_v33 = vadd.f32 %v766_v51, %v765_v43  ;;  %v910_v14 = vmul.f32 %v2755_v31, %v2755_v31  ;;  %v2767_v38 = vadd.f32 %v727_v23, %v2684_v11 }
 0x111   :  { %v707_v25 = vrot.slane %v706_v29, 2  ;;  %v736_v30 = vrot.slane %v735_v20, 1  ;;  %v775_v40 = vsel %vm289_vm0, %v638_v34, 0.0  ;;  %v753_v7 = vadd.f32 %v752_v44, %v751_v41 }
 0x112   :  { %v761_v50 = vrot.slane %v760_v37, 2  ;;  %v768_v15 = vrot.slane %v767_v33, 4  ;;  %v809_v19 = vsel %vm808_vm6, %v2755_v31, %v807_v56  ;;  %v911_v8 = vmul.f32 %v2760_v39, %v2760_v39 }
 0x113   :  { %v708_v22 = vadd.f32 %v707_v25, %v706_v29  ;;  %v745_v13 = vrot.slane %v744_v45, 1  ;;  %v776_v16 = vadd.f32 %v775_v40, %v774_v53  ;;  %v754_v55 = vrot.slane %v753_v7, 1 }
 0x114   :  { %v762_v11 = vadd.f32 %v761_v50, %v760_v37  ;;  %v769_v21 = vadd.f32 %v768_v15, %v767_v33  ;;  %v811_v58 = vsel %vm810_vm7, %v2760_v39, %v809_v19  ;;  %v941_v5 = vsel %vm808_vm6, %v910_v14, %v940_v48 }
 0x115   :  { %v709_v52 = vrot.slane %v708_v22, 1  ;;  %v2780_v46 = vadd.f32 %v718_v4, %v2682_v26  ;;  %v777_v17 = vrot.slane %v776_v16, 4  ;;  %v2786_v62 = vadd.f32 %v736_v30, %v735_v20 }
 0x116   :  { %v763_v49 = vrot.slane %v762_v11, 1  ;;  %v942_v56 = vsel %vm810_vm7, %v911_v8, %v941_v5  ;;  %v2790_v63 = vadd.f32 %v745_v13, %v744_v45  ;;  %v770_v47 = vrot.slane %v769_v21, 2 }
 0x117   :  { %v2774_v36 = vadd.f32 %v709_v52, %v708_v22  ;;  %v778_v59 = vadd.f32 %v777_v17, %v776_v16  ;;  %v2793_v2 = vadd.f32 %v754_v55, %v753_v7  ;;  %v914_v27 = vmul.f32 %v2767_v38, %v2767_v38 }
 0x118   :  { %v2798_v57 = vadd.f32 %v763_v49, %v762_v11  ;;  %v771_v0 = vadd.f32 %v770_v47, %v769_v21  ;;  %v814_v1 = vsel %vm800_vm2, %v2767_v38, %v2780_v46  ;;  %v913_v54 = vmul.f32 %v2780_v46, %v2780_v46 }
 0x119   :  { %v813_v61 = vsel %vm812_vm8, %v2774_v36, %v811_v58  ;;  %v912_v6 = vmul.f32 %v2774_v36, %v2774_v36  ;;  %v779_v4 = vrot.slane %v778_v59, 2  ;;  %v915_v12 = vmul.f32 %v2786_v62, %v2786_v62 }
 0x11a   :  { %1938 = vmatprep.mubr.msk.f32.mxu1 %vm285_vm1, %v813_v61  ;;  %v772_v29 = vrot.slane %v771_v0, 1  ;;  %v815_v24 = vsel %vm802_vm3, %v2786_v62, %v814_v1  ;;  %v916_v34 = vmul.f32 %v2790_v63, %v2790_v63  ;;  %v917_v20 = vmul.f32 %v2793_v2, %v2793_v2 }
 0x11b   :  { %v943_v26 = vsel %vm812_vm8, %v912_v6, %v942_v56  ;;  %v780_v48 = vadd.f32 %v779_v4, %v778_v59  ;;  %v816_v23 = vsel %vm804_vm4, %v2790_v63, %v815_v24  ;;  %v918_v42 = vmul.f32 %v2798_v57, %v2798_v57 }
 0x11c   :  { %v953_v60 = vsel %vm285_vm1, %v943_v26, 0.0  ;;  %v2815_v25 = vadd.f32 %v772_v29, %v771_v0  ;;  %v944_v43 = vsel %vm800_vm2, %v914_v27, %v913_v54  ;;  %v817_v45 = vsel %vm806_vm5, %v2793_v2, %v816_v23 }
 0x11d   :  { %954 = vadd.xlane.f32.xlu0 %v953_v60  ;;  %v781_v41 = vrot.slane %v780_v48, 1  ;;  %v945_v51 = vsel %vm802_vm3, %v915_v12, %v944_v43  ;;  %v818_v22 = vsel %vm808_vm6, %v2798_v57, %v817_v45  ;;  %vm1689_vm0 = vcmask 261120  }
 0x11e   :  { %v919_v44 = vmul.f32 %v2815_v25, %v2815_v25  ;;  %v946_v37 = vsel %vm804_vm4, %v916_v34, %v945_v51  ;;  %v819_v33 = vsel %vm810_vm7, %v2815_v25, %v818_v22 }
 0x11f   :  { %v2823_v53 = vadd.f32 %v781_v41, %v780_v48  ;;  %v947_v14 = vsel %vm806_vm5, %v917_v20, %v946_v37 }
 0x120   :  { %v948_v52 = vsel %vm808_vm6, %v918_v42, %v947_v14 }
 0x121   :  { %v820_v30 = vsel %vm812_vm8, %v2823_v53, %v819_v33  ;;  %v920_v40 = vmul.f32 %v2823_v53, %v2823_v53  ;;  %v949_v7 = vsel %vm810_vm7, %v919_v44, %v948_v52 }
 0x122   :  { %1939 = vmatmul.mubr.msk.f32.vlgmr.msra.gmra.mrb[0].mxu1 %vm285_vm1, %v820_v30 }
 0x123   :  { %v950_v50 = vsel %vm812_vm8, %v920_v40, %v949_v7 }
 0x124   :  { %v956_v15 = vsel %vm285_vm1, %v950_v50, 0.0 }
 0x125   :  { %957 = vadd.xlane.f32.xlu1 %v956_v15 }
 0x1aa   :  { %v955_v19 = vpop.xlane.xlu0 %954 }
 0x1ab   :  { %2235 = vrsqrt.f32 %v955_v19  ;;  %vm961_vm9 = vcmp.eq.f32.partialorder %v955_v19, inf  ;;  %v964_v55 = vand.u32 2147483648, %v955_v19  ;;  %vm963_vm10 = vcmp.eq.f32.partialorder %v955_v19, 0.0 }
 0x1b2   :  { %v958_v13 = vpop.xlane.xlu1 %957 }
 0x1b3   :  { %2237 = vrsqrt.f32 %v958_v13  ;;  %vm968_vm11 = vcmp.eq.f32.partialorder %v958_v13, inf  ;;  %v971_v27 = vand.u32 2147483648, %v958_v13  ;;  %vm970_vm12 = vcmp.eq.f32.partialorder %v958_v13, 0.0 }
 0x1b5   :  { %v2236_v8 = vpop.eup %2235 }
 0x1b6   :  { %v960_v16 = vmul.f32 %v2236_v8, %v955_v19 }
 0x1b8   :  { %v962_v11 = vsel %vm961_vm9, %v955_v19, %v960_v16 }
 0x1b9   :  { %v965_v21 = vsel %vm963_vm10, %v964_v55, %v962_v11 }
 0x1ba   :  { %v973_v58 = vmax.f32 %v965_v21, 1e-12  ;;  %v1103_v21 = vld [vmem:[#allocation3 + $0x8] sm:$0xff] }
 0x1bc   :  { %v977_v5 = vrot.slane %v973_v58, 1  ;;  %v978_v17 = vrot.slane %v973_v58, 2  ;;  %v979_v61 = vrot.slane %v973_v58, 3  ;;  %v980_v6 = vrot.slane %v973_v58, 4 }
 0x1bd   :  { %2239 = vrcp.f32 %v973_v58  ;;  %v981_v49 = vrot.slane %v973_v58, 5  ;;  %v982_v56 = vrot.slane %v973_v58, 6  ;;  %v2238_v47 = vpop.eup %2237  ;;  %v983_v59 = vrot.slane %v973_v58, 7  ;;  %v1105_v58 = vld [vmem:[#allocation3 + $0x18] sm:$0xff] }
 0x1be   :  { %2241 = vrcp.f32 %v977_v5  ;;  %v967_v26 = vmul.f32 %v2238_v47, %v958_v13  ;;  %v1102_v5 = vld [vmem:[#allocation3] sm:$0xff]  ;;  %v1107_v47 = vld [vmem:[#allocation3 + $0x28] sm:$0xff] }
 0x1bf   :  { %2243 = vrcp.f32 %v978_v17  ;;  %v2006_v17 = vpack.c.bf16 %v1105_v58, %v1103_v21 }
 0x1c0   :  { %2245 = vrcp.f32 %v979_v61  ;;  %v969_v60 = vsel %vm968_vm11, %v958_v13, %v967_v26  ;;  %v1104_v61 = vld [vmem:[#allocation3 + $0x10] sm:$0xff] }
 0x1c1   :  { %2247 = vrcp.f32 %v980_v6  ;;  %v972_v0 = vsel %vm970_vm12, %v971_v27, %v969_v60  ;;  %2007 = vmatprep.subr.bf16.mxu1 %v2006_v17 }
 0x1c2   :  { %2249 = vrcp.f32 %v981_v49  ;;  %v974_v4 = vmax.f32 %v972_v0, 1e-12 }
 0x1c3   :  { %2251 = vrcp.f32 %v982_v56  ;;  %v2008_v56 = vpack.c.bf16 %v1104_v61, %v1102_v5 }
 0x1c4   :  { %2253 = vrcp.f32 %v983_v59  ;;  %v984_v54 = vrot.slane %v974_v4, 1  ;;  %v985_v12 = vrot.slane %v974_v4, 2  ;;  %v986_v48 = vrot.slane %v974_v4, 3 }
 0x1c5   :  { %v987_v23 = vrot.slane %v974_v4, 4  ;;  %2255 = vrcp.f32 %v974_v4  ;;  %v988_v43 = vrot.slane %v974_v4, 5  ;;  %v989_v44 = vrot.slane %v974_v4, 6  ;;  %2009 = vmatpush1.bf16.msra.mxu1 %v2008_v56 }
 0x1c6   :  { %2257 = vrcp.f32 %v984_v54  ;;  %1131 = vmatprep.subr.mxu1 %v1107_v47 }
 0x1c7   :  { %v2240_v1 = vpop.eup %2239  ;;  %2259 = vrcp.f32 %v985_v12 }
 0x1c8   :  { %v2242_v29 = vpop.eup %2241  ;;  %v1008_v41 = vmul.f32 %v2240_v1, %v2711_v32  ;;  %2261 = vrcp.f32 %v986_v48 }
 0x1c9   :  { %v2244_v24 = vpop.eup %2243  ;;  %v1010_v34 = vmul.f32 %v2242_v29, %v2705_v10  ;;  %v990_v10 = vrot.slane %v974_v4, 7  ;;  %2263 = vrcp.f32 %v987_v23  ;;  %v1106_v29 = vld [vmem:[#allocation3 + $0x20] sm:$0xff] }
 0x1ca   :  { %v2246_v20 = vpop.eup %2245  ;;  %v1012_v42 = vmul.f32 %v2244_v24, %v2707_v18  ;;  %2265 = vrcp.f32 %v988_v43  ;;  %1132 = vmatpush1.msra.mxu1 %v1106_v29 }
 0x1cb   :  { %v2248_v45 = vpop.eup %2247  ;;  %v1014_v51 = vmul.f32 %v2246_v20, %v2714_v35  ;;  %v1055_v22 = vrot.slane %v1010_v34, 7  ;;  %2267 = vrcp.f32 %v989_v44 }
 0x1cc   :  { %v2250_v37 = vpop.eup %2249  ;;  %v1016_v33 = vmul.f32 %v2248_v45, %v2720_v28  ;;  %v1057_v14 = vrot.slane %v1012_v42, 6  ;;  %2269 = vrcp.f32 %v990_v10  ;;  %v2279_v10 = vld [vmem:[%s2993_s0] sm:$0xff] }
 0x1cd   :  { %v2252_v30 = vpop.eup %2251  ;;  %v1018_v40 = vmul.f32 %v2250_v37, %v2755_v31  ;;  %v1056_v32 = vsel %vm800_vm2, %v1055_v22, %v1008_v41  ;;  %v1059_v18 = vrot.slane %v1014_v51, 5 }
 0x1ce   :  { %v2254_v52 = vpop.eup %2253  ;;  %v1020_v7 = vmul.f32 %v2252_v30, %v2760_v39  ;;  %v1058_v35 = vsel %vm802_vm3, %v1057_v14, %v1056_v32  ;;  %v1061_v50 = vrot.slane %v1016_v33, 4 }
 0x1cf   :  { %v1022_v15 = vmul.f32 %v2254_v52, %v2774_v36  ;;  %v1060_v28 = vsel %vm804_vm4, %v1059_v18, %v1058_v35  ;;  %v1063_v19 = vrot.slane %v1018_v40, 3  ;;  %v2256_v39 = vpop.eup %2255  ;;  %v2280_v40 = vld [vmem:[%s2993_s0 + $0x8] sm:$0xff] }
 0x1d0   :  { %v1062_v8 = vsel %vm806_vm5, %v1061_v50, %v1060_v28  ;;  %v1065_v31 = vrot.slane %v1020_v7, 2  ;;  %v2258_v36 = vpop.eup %2257  ;;  %v1024_v60 = vmul.f32 %v2256_v39, %v2780_v46 }
 0x1d1   :  { %v1064_v13 = vsel %vm808_vm6, %v1063_v19, %v1062_v8  ;;  %v1067_v16 = vrot.slane %v1022_v15, 1  ;;  %v2260_v6 = vpop.eup %2259  ;;  %v1026_v49 = vmul.f32 %v2258_v36, %v2767_v38  ;;  %v1108_v8 = vld [vmem:[%s2997_s4] ss:$8 sm:$0x3] }
 0x1d2   :  { %v1066_v55 = vsel %vm810_vm7, %v1065_v31, %v1064_v13  ;;  %v2262_v59 = vpop.eup %2261  ;;  %v1028_v26 = vmul.f32 %v2260_v6, %v2786_v62  ;;  %v2897_v31 = vsub.s32 1, %v2360_v3  ;;  %v1113_v13 = vrot.slane %v1108_v8, %v2376_v9 }
 0x1d3   :  { %v1068_v11 = vsel %vm812_vm8, %v1067_v16, %v1066_v55  ;;  %v2264_v27 = vpop.eup %2263  ;;  %v1030_v0 = vmul.f32 %v2262_v59, %v2790_v63  ;;  %v1069_v4 = vrot.slane %v1026_v49, 7 }
 0x1d4   :  { %1083 = vrot.lane.b32.xlu0 %v1068_v11, %s2309_s2  ;;  %v2266_v1 = vpop.eup %2265  ;;  %v1032_v54 = vmul.f32 %v2264_v27, %v2793_v2  ;;  %v1071_v12 = vrot.slane %v1028_v26, 6  ;;  %v1117_v55 = vrot.slane %v1108_v8, %v2897_v31  ;;  %v1344_v8 = vld [vmem:[#allocation3 + $0x130] sm:$0xff] }
 0x1d5   :  { %v2268_v38 = vpop.eup %2267  ;;  %v1034_v48 = vmul.f32 %v2266_v1, %v2798_v57  ;;  %v1070_v24 = vsel %vm800_vm2, %v1069_v4, %v1024_v60  ;;  %v1073_v62 = vrot.slane %v1030_v0, 5 }
 0x1d6   :  { %v2270_v34 = vpop.eup %2269  ;;  %v1036_v23 = vmul.f32 %v2268_v38, %v2815_v25  ;;  %v1072_v46 = vsel %vm802_vm3, %v1071_v12, %v1070_v24  ;;  %v1075_v63 = vrot.slane %v1032_v54, 4  ;;  %v2310_v25 = vmov 0.0  }
 0x1d7   :  { %v1038_v20 = vmul.f32 %v2270_v34, %v2823_v53  ;;  %v1074_v41 = vsel %vm804_vm4, %v1073_v62, %v1072_v46  ;;  %v1077_v2 = vrot.slane %v1034_v48, 3  ;;  %1191 = vmatprep.mubr.f32.mxu1 %v2310_v25  ;;  %v900_v53 = vstv %s2998_s5 }
 0x1d8   :  { %v1076_v42 = vsel %vm806_vm5, %v1075_v63, %v1074_v41  ;;  %v1079_v43 = vrot.slane %v1036_v23, 2 }
 0x1d9   :  { %v1078_v57 = vsel %vm808_vm6, %v1077_v2, %v1076_v42  ;;  %v1081_v45 = vrot.slane %v1038_v20, 1 }
 0x1da   :  { %v1080_v51 = vsel %vm810_vm7, %v1079_v43, %v1078_v57 }
 0x1db   :  { %v1082_v22 = vsel %vm812_vm8, %v1081_v45, %v1080_v51 }
 0x1dc   :  { %1085 = vrot.lane.b32.xlu1 %v1082_v22, %s2309_s2 }
 0x1f5   :  { %v1940_v44 = vpop.f32.mrb[0].mxu1 }
 0x1f6   :  { %v891_v37 = vpop.f32.mrb[1].mxu1  ;;  %v902_v14 = vmul.f32 %v1940_v44, %v900_v53 }
 0x1f7   :  { %v901_v33 = vmul.f32 %v900_v53, %v891_v37 }
 0x1f8   :  { %v2887_v32 = vadd.f32 %v2280_v40, %v902_v14 }
 0x1f9   :  { %v2880_v30 = vadd.f32 %v2279_v10, %v901_v33 }
 0x1fb   :  { %1091 = vrot.lane.b32.xlu1 %v2880_v30, %s2307_s8 }
 0x1ff   :  { %1093 = vrot.lane.b32.xlu1 %v2887_v32, %s2307_s8  ;;  %s2311_s8 = smov 64  }
 0x246   :  { %v1084_v52 = vpop.permute.xlu0 %1083 }
 0x247   :  { %v1097_v7 = vsel %vm285_vm1, %v2279_v10, %v1084_v52 }
 0x24e   :  { %v1086_v18 = vpop.permute.xlu1 %1085 }
 0x24f   :  { %v1098_v15 = vsel %vm285_vm1, %v2280_v40, %v1086_v18 }
 0x26d   :  { %v1092_v35 = vpop.permute.xlu1 %1091 }
 0x26e   :  { %v1100_v50 = vsel %vm1099_vm13, %v1097_v7, %v1092_v35 }
 0x26f   :  { %1853 = vmatmul.mubr.msk.f32.vlgmr.msra.gmra.mrb[2].mxu1 %vm1120_vm14, %v1100_v50 }
 0x270   :  { %1197 = vmatprep.mubr.f32.mxu1 %v2310_v25 }
 0x271   :  { %v1094_v28 = vpop.permute.xlu1 %1093 }
 0x272   :  { %v1101_v19 = vsel %vm1099_vm13, %v1098_v15, %v1094_v28 }
 0x273   :  { %1854 = vmatmul.mubr.msk.f32.gmra.mrb[4].mxu1 %vm1120_vm14, %v1101_v19 }
 0x342   :  { %v1193_v16 = vpop.f32.mrb[2].mxu1 }
 0x343   :  { %v1195_v39 = vpop.f32.mrb[3].mxu1  ;;  %v1194_v11 = vadd.f32 %v1193_v16, %v1113_v13  ;;  %v1328_v16 = vld [vmem:[#allocation3 + $0x30] sm:$0xff] }
 0x344   :  { %v1196_v21 = vadd.f32 %v1195_v39, %v1117_v55  ;;  %v1329_v39 = vld [vmem:[#allocation3 + $0x40] sm:$0xff] }
 0x345   :  { %v1204_v61 = vmax.f32 %v1194_v11, 0.0  ;;  %v1346_v11 = vld [vmem:[#allocation3 + $0x150] sm:$0xff] }
 0x346   :  { %v1199_v58 = vpop.f32.mrb[4].mxu1  ;;  %v1205_v49 = vmax.f32 %v1196_v21, 0.0  ;;  %v1347_v21 = vld [vmem:[#allocation3 + $0x160] sm:$0xff] }
 0x347   :  { %v1200_v5 = vadd.f32 %v1199_v58, %v1113_v13  ;;  %v1201_v36 = vpop.f32.mrb[5].mxu1  ;;  %v1345_v13 = vld [vmem:[#allocation3 + $0x140] sm:$0xff]  ;;  %v2012_v58 = vpack.c.bf16 %v1329_v39, %v1328_v16 }
 0x348   :  { %v1202_v17 = vadd.f32 %v1201_v36, %v1117_v55  ;;  %v2010_v55 = vpack.c.bf16 %v1345_v13, %v1344_v8  ;;  %v1330_v36 = vld [vmem:[#allocation3 + $0x50] sm:$0xff]  ;;  %v1855_v8 = vld [vmem:[%s2997_s4 + $0x1] ss:$8 sm:$0x3] }
 0x349   :  { %v1206_v6 = vmax.f32 %v1200_v5, 0.0  ;;  %v2014_v5 = vpack.c.bf16 %v1347_v21, %v1346_v11  ;;  %v1292_v13 = vrot.slane %v1855_v8, %v2376_v9  ;;  %v1296_v16 = vrot.slane %v1855_v8, %v2897_v31 }
 0x34a   :  { %v1207_v56 = vmax.f32 %v1202_v17, 0.0  ;;  %v1331_v17 = vld [vmem:[#allocation3 + $0x60] sm:$0xff]  ;;  %2011 = vmatprep.subr.bf16.mxu0 %v2010_v55 }
 0x34b   :  { %v1208_v47 = vadd.f32 %v1206_v6, %v1204_v61  ;;  %2013 = vmatpush3.bf16.msra.mxu0 %v2012_v58  ;;  %v1856_v55 = vld [vmem:[%s2997_s4 + $0x2] ss:$8 sm:$0x3] }
 0x34c   :  { %v1215_v59 = vadd.f32 %v1207_v56, %v1205_v49  ;;  %2015 = vmatprep.subr.bf16.mxu0 %v2014_v5 }
 0x34d   :  { %v1209_v3 = vrot.slane %v1208_v47, 4 }
 0x34e   :  { %v1216_v26 = vrot.slane %v1215_v59, 4 }
 0x34f   :  { %v1210_v27 = vadd.f32 %v1209_v3, %v1208_v47  ;;  %v1332_v47 = vld [vmem:[#allocation3 + $0x70] sm:$0xff] }
 0x350   :  { %v1217_v60 = vadd.f32 %v1216_v26, %v1215_v59  ;;  %v1333_v59 = vld [vmem:[#allocation3 + $0x80] sm:$0xff]  ;;  %v1350_v3 = vld [vmem:[#allocation3 + $0x190] sm:$0xff] }
 0x351   :  { %v1211_v0 = vrot.slane %v1210_v27, 2  ;;  %v1351_v26 = vld [vmem:[#allocation3 + $0x1a0] sm:$0xff] }
 0x352   :  { %v1218_v4 = vrot.slane %v1217_v60, 2 }
 0x353   :  { %v1212_v1 = vadd.f32 %v1211_v0, %v1210_v27  ;;  %v2020_v27 = vpack.c.bf16 %v1333_v59, %v1332_v47  ;;  %v1334_v0 = vld [vmem:[#allocation3 + $0x90] sm:$0xff] }
 0x354   :  { %v1219_v54 = vadd.f32 %v1218_v4, %v1217_v60  ;;  %v2022_v60 = vpack.c.bf16 %v1351_v26, %v1350_v3  ;;  %v1335_v4 = vld [vmem:[#allocation3 + $0xa0] sm:$0xff] }
 0x355   :  { %v1213_v12 = vrot.slane %v1212_v1, 1 }
 0x356   :  { %v1220_v29 = vrot.slane %v1219_v54, 1 }
 0x357   :  { %v1214_v38 = vadd.f32 %v1213_v12, %v1212_v1  ;;  %v1352_v1 = vld [vmem:[#allocation3 + $0x1b0] sm:$0xff]  ;;  %v2024_v12 = vpack.c.bf16 %v1335_v4, %v1334_v0  ;;  %v1472_v0 = vld [vmem:[#allocation3 + $0x260] sm:$0xff] }
 0x358   :  { %v1221_v48 = vadd.f32 %v1220_v29, %v1219_v54  ;;  %v1353_v54 = vld [vmem:[#allocation3 + $0x1c0] sm:$0xff]  ;;  %v1473_v4 = vld [vmem:[#allocation3 + $0x270] sm:$0xff] }
 0x359   :  { %1223 = vrot.lane.b32.xlu0 %v1214_v38, %s2311_s8  ;;  %v2026_v29 = vpack.c.bf16 %v1353_v54, %v1352_v1  ;;  %v1474_v1 = vld [vmem:[#allocation3 + $0x280] sm:$0xff]  ;;  %v1475_v54 = vld [vmem:[#allocation3 + $0x290] sm:$0xff] }
 0x35a   :  { %1229 = vrot.lane.b32.xlu1 %v1221_v48, %s2311_s8 }
 0x3cb   :  { %v1224_v24 = vpop.permute.xlu0 %1223 }
 0x3cc   :  { %v1226_v62 = vadd.f32 %v1224_v24, %v1214_v38  ;;  %v1230_v23 = vpop.permute.xlu1 %1229  ;;  %v1336_v38 = vld [vmem:[#allocation3 + $0xb0] sm:$0xff] }
 0x3cd   :  { %v1354_v24 = vld [vmem:[#allocation3 + $0x1d0] sm:$0xff] }
 0x3ce   :  { %v1227_v34 = vadd.f32 %v1226_v62, %v1221_v48  ;;  %v1337_v48 = vld [vmem:[#allocation3 + $0xc0] sm:$0xff] }
 0x3cf   :  { %v1355_v62 = vld [vmem:[#allocation3 + $0x1e0] sm:$0xff] }
 0x3d0   :  { %v1232_v46 = vadd.f32 %v1230_v23, %v1227_v34  ;;  %v2028_v34 = vpack.c.bf16 %v1337_v48, %v1336_v38  ;;  %v2030_v23 = vpack.c.bf16 %v1355_v62, %v1354_v24  ;;  %v1477_v38 = vld [vmem:[#allocation3 + $0x2b0] sm:$0xff]  ;;  %v1478_v48 = vld [vmem:[#allocation3 + $0x2c0] sm:$0xff] }
 0x3d1   :  { %v2058_v24 = vpack.c.bf16 %v1478_v48, %v1477_v38  ;;  %v1479_v62 = vld [vmem:[#allocation3 + $0x2d0] sm:$0xff]  ;;  %v1604_v48 = vld [vmem:[#allocation3 + $0x3a0] sm:$0xff] }
 0x3d2   :  { %v1234_v63 = vmul.f32 0.015625, %v1232_v46  ;;  %v1338_v46 = vld [vmem:[#allocation3 + $0xd0] sm:$0xff] }
 0x3d3   :  { %v1603_v38 = vld [vmem:[#allocation3 + $0x390] sm:$0xff] }
 0x3d4   :  { %1236 = vrot.lane.b32.xlu0 %v1234_v63, %s2311_s8 }
 0x446   :  { %v1237_v20 = vpop.permute.xlu0 %1236 }
 0x447   :  { %v1240_v41 = vsel %vm1239_vm15, %v1234_v63, %v1237_v20  ;;  %v1339_v63 = vld [vmem:[#allocation3 + $0xe0] sm:$0xff] }
 0x448   :  { %v1244_v2 = vrot.slane %v1240_v41, %v2376_v9  ;;  %v2032_v20 = vpack.c.bf16 %v1339_v63, %v1338_v46  ;;  %v1481_v46 = vld [vmem:[#allocation3 + $0x2f0] sm:$0xff]  ;;  %v1482_v63 = vld [vmem:[#allocation3 + $0x300] sm:$0xff] }
 0x44a   :  { %v2906_v42 = vsub.f32 %v1204_v61, %v1244_v2  ;;  %v2908_v43 = vsub.f32 %v1205_v49, %v1244_v2  ;;  %v2910_v57 = vsub.f32 %v1206_v6, %v1244_v2  ;;  %v2912_v45 = vsub.f32 %v1207_v56, %v1244_v2  ;;  %v1348_v61 = vld [vmem:[#allocation3 + $0x170] sm:$0xff]  ;;  %v1349_v6 = vld [vmem:[#allocation3 + $0x180] sm:$0xff] }
 0x44b   :  { %v2016_v49 = vpack.c.bf16 %v1331_v17, %v1330_v36  ;;  %v2018_v56 = vpack.c.bf16 %v1349_v6, %v1348_v61  ;;  %v1317_v36 = vrot.slane %v1856_v55, %v2376_v9  ;;  %v1321_v17 = vrot.slane %v1856_v55, %v2897_v31 }
 0x44c   :  { %v1250_v51 = vmul.f32 %v2908_v43, %v2908_v43  ;;  %v1252_v22 = vmul.f32 %v2912_v45, %v2912_v45  ;;  %v1249_v25 = vmul.f32 %v2906_v42, %v2906_v42  ;;  %v1251_v53 = vmul.f32 %v2910_v57, %v2910_v57 }
 0x44d   :  { %2017 = vmatpush3.bf16.msra.mxu0 %v2016_v49  ;;  %v1300_v21 = vmul.f32 %v1296_v16, %v2908_v43  ;;  %v1299_v58 = vmul.f32 %v1292_v13, %v2906_v42  ;;  %v1302_v61 = vmul.f32 %v1296_v16, %v2912_v45  ;;  %v1301_v47 = vmul.f32 %v1292_v13, %v2910_v57 }
 0x44e   :  { %v1260_v44 = vadd.f32 %v1252_v22, %v1250_v51  ;;  %v1253_v37 = vadd.f32 %v1251_v53, %v1249_v25  ;;  %2019 = vmatprep.subr.bf16.mxu0 %v2018_v56  ;;  %v2050_v57 = vpack.c.bf16 %v1474_v1, %v1473_v4  ;;  %v1600_v1 = vld [vmem:[#allocation3 + $0x360] sm:$0xff] }
 0x450   :  { %v1261_v33 = vrot.slane %v1260_v44, 4  ;;  %v1254_v14 = vrot.slane %v1253_v37, 4 }
 0x451   :  { %2021 = vmatpush3.bf16.msra.mxu0 %v2020_v27  ;;  %v1469_v27 = vld [vmem:[#allocation3 + $0x230] sm:$0xff] }
 0x452   :  { %v1262_v10 = vadd.f32 %v1261_v33, %v1260_v44  ;;  %v1255_v40 = vadd.f32 %v1254_v14, %v1253_v37  ;;  %2023 = vmatprep.subr.bf16.mxu0 %v2022_v60  ;;  %v1356_v37 = vld [vmem:[#allocation3 + $0x1f0] sm:$0xff]  ;;  %v1357_v33 = vld [vmem:[#allocation3 + $0x200] sm:$0xff] }
 0x453   :  { %v1340_v14 = vld [vmem:[#allocation3 + $0xf0] sm:$0xff] }
 0x454   :  { %v1263_v18 = vrot.slane %v1262_v10, 2  ;;  %v1256_v52 = vrot.slane %v1255_v40, 2  ;;  %v1471_v60 = vld [vmem:[#allocation3 + $0x250] sm:$0xff] }
 0x455   :  { %2025 = vmatpush3.bf16.msra.mxu0 %v2024_v12  ;;  %v2046_v45 = vpack.c.bf16 %v1472_v0, %v1471_v60  ;;  %v1476_v12 = vld [vmem:[#allocation3 + $0x2a0] sm:$0xff] }
 0x456   :  { %v1264_v7 = vadd.f32 %v1263_v18, %v1262_v10  ;;  %v1257_v35 = vadd.f32 %v1256_v52, %v1255_v40  ;;  %2027 = vmatprep.subr.bf16.mxu0 %v2026_v29  ;;  %v2034_v10 = vpack.c.bf16 %v1357_v33, %v1356_v37  ;;  %v1341_v40 = vld [vmem:[#allocation3 + $0x100] sm:$0xff]  ;;  %v1358_v18 = vld [vmem:[#allocation3 + $0x210] sm:$0xff]  ;;  %v2054_v29 = vpack.c.bf16 %v1476_v12, %v1475_v54 }
 0x457   :  { %v1359_v52 = vld [vmem:[#allocation3 + $0x220] sm:$0xff]  ;;  %v1601_v54 = vld [vmem:[#allocation3 + $0x370] sm:$0xff] }
 0x458   :  { %v1265_v50 = vrot.slane %v1264_v7, 1  ;;  %v1258_v15 = vrot.slane %v1257_v35, 1  ;;  %v1360_v37 = vld [vmem:[%s2997_s4 + $0x3] ss:$0 sm:$0xff] }
 0x459   :  { %2029 = vmatpush3.bf16.msra.mxu0 %v2028_v34  ;;  %v1480_v34 = vld [vmem:[#allocation3 + $0x2e0] sm:$0xff] }
 0x45a   :  { %v1266_v28 = vadd.f32 %v1265_v50, %v1264_v7  ;;  %v1259_v19 = vadd.f32 %v1258_v15, %v1257_v35  ;;  %2031 = vmatprep.subr.bf16.mxu0 %v2030_v23  ;;  %v2036_v7 = vpack.c.bf16 %v1341_v40, %v1340_v14  ;;  %v2038_v35 = vpack.c.bf16 %v1359_v52, %v1358_v18  ;;  %v1342_v50 = vld [vmem:[#allocation3 + $0x110] sm:$0xff]  ;;  %v1343_v15 = vld [vmem:[#allocation3 + $0x120] sm:$0xff] }
 0x45b   :  { %v2062_v23 = vpack.c.bf16 %v1480_v34, %v1479_v62  ;;  %v1598_v0 = vld [vmem:[#allocation3 + $0x340] sm:$0xff] }
 0x45c   :  { %1274 = vrot.lane.b32.xlu0 %v1266_v28, %s2311_s8  ;;  %1268 = vrot.lane.b32.xlu1 %v1259_v19, %s2311_s8  ;;  %v1602_v12 = vld [vmem:[#allocation3 + $0x380] sm:$0xff] }
 0x45d   :  { %2033 = vmatpush3.bf16.msra.mxu0 %v2032_v20  ;;  %v2066_v20 = vpack.c.bf16 %v1482_v63, %v1481_v46  ;;  %v1485_v62 = vld [vmem:[%s2997_s4 + $0x6] ss:$0 sm:$0xff] }
 0x45e   :  { %2035 = vmatprep.subr.bf16.mxu0 %v2034_v10 }
 0x461   :  { %2037 = vmatpush3.bf16.msra.mxu0 %v2036_v7 }
 0x462   :  { %2039 = vmatprep.subr.bf16.mxu0 %v2038_v35 }
 0x4ce   :  { %v1269_v41 = vpop.permute.xlu1 %1268  ;;  %v1275_v22 = vpop.permute.xlu0 %1274 }
 0x4cf   :  { %v1271_v2 = vadd.f32 %v1269_v41, %v1259_v19  ;;  %v2040_v19 = vpack.c.bf16 %v1343_v15, %v1342_v50  ;;  %v1483_v41 = vld [vmem:[#allocation3 + $0x310] sm:$0xff] }
 0x4d1   :  { %v1272_v51 = vadd.f32 %v1271_v2, %v1266_v28  ;;  %2041 = vmatpush3.bf16.msra.mxu0 %v2040_v19  ;;  %v1484_v2 = vld [vmem:[#allocation3 + $0x320] sm:$0xff] }
 0x4d3   :  { %v1277_v25 = vadd.f32 %v1275_v22, %v1272_v51  ;;  %v2070_v51 = vpack.c.bf16 %v1484_v2, %v1483_v41 }
 0x4d5   :  { %v1278_v53 = vmul.f32 0.015625, %v1277_v25 }
 0x4d7   :  { %v1279_v44 = vadd.f32 1e-05, %v1278_v53 }
 0x4d9   :  { %2271 = vrsqrt.f32 %v1279_v44 }
 0x4e3   :  { %v2272_v28 = vpop.eup %2271 }
 0x4e4   :  { %1282 = vrot.lane.b32.xlu1 %v2272_v28, %s2311_s8 }
 0x556   :  { %v1283_v39 = vpop.permute.xlu1 %1282 }
 0x557   :  { %v1285_v11 = vsel %vm1239_vm15, %v2272_v28, %v1283_v39 }
 0x558   :  { %v1306_v5 = vrot.slane %v1285_v11, %v2376_v9  ;;  %v1470_v9 = vld [vmem:[#allocation3 + $0x240] sm:$0xff] }
 0x559   :  { %v2042_v31 = vpack.c.bf16 %v1470_v9, %v1469_v27 }
 0x55a   :  { %v1308_v6 = vmul.f32 %v1306_v5, %v1300_v21  ;;  %v1307_v49 = vmul.f32 %v1306_v5, %v1299_v58  ;;  %v1310_v56 = vmul.f32 %v1306_v5, %v1302_v61  ;;  %v1309_v26 = vmul.f32 %v1306_v5, %v1301_v47 }
 0x55b   :  { %2043 = vmatprep.subr.bf16.mxu1 %v2042_v31 }
 0x55c   :  { %v1325_v59 = vadd.f32 %v1321_v17, %v1308_v6  ;;  %v1324_v3 = vadd.f32 %v1317_v36, %v1307_v49  ;;  %v1327_v43 = vadd.f32 %v1321_v17, %v1310_v56  ;;  %v1326_v42 = vadd.f32 %v1317_v36, %v1309_v26  ;;  %2045 = vmatpush3.bf16.msra.mxu1 %v2042_v31  ;;  %v1361_v49 = vld [vmem:[%s2997_s4 + $0x4] ss:$0 sm:$0xff]  ;;  %v1597_v31 = vld [vmem:[#allocation3 + $0x330] sm:$0xff] }
 0x55d   :  { %2047 = vmatprep.subr.bf16.mxu1 %v2046_v45  ;;  %v2074_v4 = vpack.c.bf16 %v1598_v0, %v1597_v31 }
 0x55e   :  { %1427 = vmatprep.mubr.f32.mxu0 %v1325_v59 }
 0x55f   :  { %1428 = vmatmul.mubr.f32.vlgmr.msra.gmra.mrb[0].mxu0 %v1324_v3  ;;  %v1362_v3 = vld [vmem:[%s2997_s4 + $0x5] ss:$0 sm:$0xff]  ;;  %2075 = vmatprep.subr.bf16.mxu0 %v2074_v4 }
 0x560   :  { %1432 = vmatprep.mubr.f32.mxu0 %v1327_v43  ;;  %2049 = vmatpush3.bf16.msra.mxu1 %v2046_v45  ;;  %v1599_v45 = vld [vmem:[#allocation3 + $0x350] sm:$0xff] }
 0x561   :  { %2051 = vmatprep.subr.bf16.mxu1 %v2050_v57  ;;  %2077 = vmatpush3.bf16.msra.mxu0 %v2074_v4 }
 0x563   :  { %1433 = vmatmul.mubr.f32.gmra.mrb[2].mxu0 %v1326_v42 }
 0x564   :  { %2053 = vmatpush3.bf16.msra.mxu1 %v2050_v57  ;;  %v2078_v57 = vpack.c.bf16 %v1600_v1, %v1599_v45 }
 0x565   :  { %2055 = vmatprep.subr.bf16.mxu1 %v2054_v29 }
 0x566   :  { %2079 = vmatprep.subr.bf16.mxu0 %v2078_v57 }
 0x567   :  { %2081 = vmatpush3.bf16.msra.mxu0 %v2078_v57 }
 0x568   :  { %2057 = vmatpush3.bf16.msra.mxu1 %v2054_v29  ;;  %v2082_v29 = vpack.c.bf16 %v1602_v12, %v1601_v54 }
 0x569   :  { %2059 = vmatprep.subr.bf16.mxu1 %v2058_v24 }
 0x56a   :  { %2083 = vmatprep.subr.bf16.mxu0 %v2082_v29 }
 0x56b   :  { %2085 = vmatpush3.bf16.msra.mxu0 %v2082_v29 }
 0x56c   :  { %2061 = vmatpush3.bf16.msra.mxu1 %v2058_v24  ;;  %v2086_v24 = vpack.c.bf16 %v1604_v48, %v1603_v38 }
 0x56d   :  { %2063 = vmatprep.subr.bf16.mxu1 %v2062_v23 }
 0x56e   :  { %2087 = vmatprep.subr.bf16.mxu0 %v2086_v24 }
 0x56f   :  { %2089 = vmatpush3.bf16.msra.mxu0 %v2086_v24 }
 0x570   :  { %2065 = vmatpush3.bf16.msra.mxu1 %v2062_v23 }
 0x571   :  { %2067 = vmatprep.subr.bf16.mxu1 %v2066_v20 }
 0x574   :  { %2069 = vmatpush3.bf16.msra.mxu1 %v2066_v20 }
 0x575   :  { %2071 = vmatprep.subr.bf16.mxu1 %v2070_v51 }
 0x578   :  { %2073 = vmatpush3.bf16.msra.mxu1 %v2070_v51 }
 0x632   :  { %v1896_v22 = vpop.f32.mrb[0].mxu0 }
 0x633   :  { %v1897_v25 = vpop.f32.mrb[1].mxu0 }
 0x634   :  { %v1898_v53 = vadd.f32 %v1897_v25, %v1896_v22 }
 0x636   :  { %v1899_v44 = vpop.f32.mrb[2].mxu0  ;;  %v1430_v10 = vadd.f32 %v1898_v53, %v1360_v37 }
 0x637   :  { %v1900_v33 = vpop.f32.mrb[3].mxu0 }
 0x638   :  { %v1901_v14 = vadd.f32 %v1900_v33, %v1899_v44 }
 0x63a   :  { %v1435_v40 = vadd.f32 %v1901_v14, %v1360_v37 }
 0x63c   :  { %v1438_v18 = vadd.f32 %v1435_v40, %v1430_v10 }
 0x63e   :  { %v1439_v52 = vrot.slane %v1438_v18, 4 }
 0x640   :  { %v1440_v7 = vadd.f32 %v1439_v52, %v1438_v18 }
 0x642   :  { %v1441_v35 = vrot.slane %v1440_v7, 2 }
 0x644   :  { %v1442_v50 = vadd.f32 %v1441_v35, %v1440_v7 }
 0x646   :  { %v1443_v15 = vrot.slane %v1442_v50, 1 }
 0x648   :  { %v1444_v19 = vadd.f32 %v1443_v15, %v1442_v50 }
 0x64a   :  { %v1446_v28 = vmul.f32 0.0625, %v1444_v19 }
 0x64c   :  { %v1447_v8 = vsub.f32 %v1430_v10, %v1446_v28  ;;  %v1448_v13 = vsub.f32 %v1435_v40, %v1446_v28 }
 0x64e   :  { %v1449_v16 = vmul.f32 %v1447_v8, %v1447_v8  ;;  %v1450_v55 = vmul.f32 %v1448_v13, %v1448_v13  ;;  %v1460_v56 = vmul.f32 %v1448_v13, %v1361_v49  ;;  %v1459_v47 = vmul.f32 %v1447_v8, %v1361_v49 }
 0x650   :  { %v1451_v39 = vadd.f32 %v1450_v55, %v1449_v16 }
 0x652   :  { %v1452_v11 = vrot.slane %v1451_v39, 4 }
 0x654   :  { %v1453_v21 = vadd.f32 %v1452_v11, %v1451_v39  ;;  %v1486_v39 = vld [vmem:[%s2997_s4 + $0x7] ss:$0 sm:$0xff] }
 0x656   :  { %v1454_v58 = vrot.slane %v1453_v21, 2 }
 0x658   :  { %v1455_v5 = vadd.f32 %v1454_v58, %v1453_v21 }
 0x65a   :  { %v1456_v36 = vrot.slane %v1455_v5, 1 }
 0x65c   :  { %v1457_v17 = vadd.f32 %v1456_v36, %v1455_v5  ;;  %v1487_v5 = vld [vmem:[%s2997_s4 + $0x10] ss:$0 sm:$0xff] }
 0x65e   :  { %v1458_v61 = vmul.f32 0.0625, %v1457_v17 }
 0x660   :  { %v1461_v6 = vadd.f32 1e-05, %v1458_v61 }
 0x662   :  { %2273 = vrsqrt.f32 %v1461_v6 }
 0x66c   :  { %v2274_v59 = vpop.eup %2273 }
 0x66d   :  { %v1463_v26 = vmul.f32 %v2274_v59, %v1459_v47  ;;  %v1464_v43 = vmul.f32 %v2274_v59, %v1460_v56  ;;  %v1724_v47 = vld [vmem:[#allocation3 + $0x3b0] sm:$0xff]  ;;  %v1725_v59 = vld [vmem:[#allocation3 + $0x3c0] sm:$0xff] }
 0x66f   :  { %v1465_v42 = vadd.f32 %v1463_v26, %v1362_v3  ;;  %v1466_v27 = vadd.f32 %v1464_v43, %v1362_v3  ;;  %v1726_v3 = vld [vmem:[#allocation3 + $0x3d0] sm:$0xff]  ;;  %v2090_v26 = vpack.c.bf16 %v1725_v59, %v1724_v47  ;;  %v1727_v43 = vld [vmem:[#allocation3 + $0x3e0] sm:$0xff] }
 0x671   :  { %v1467_v9 = vmax.f32 %v1465_v42, 0.0  ;;  %v1468_v60 = vmax.f32 %v1466_v27, 0.0  ;;  %v2094_v42 = vpack.c.bf16 %v1727_v43, %v1726_v3  ;;  %2091 = vmatprep.subr.bf16.mxu1 %v2090_v26  ;;  %v1605_v27 = vld [vmem:[%s2997_s4 + $0x11] ss:$0 sm:$0xff] }
 0x673   :  { %1973 = vmatprep.mubr.f32.mxu1 %v1467_v9 }
 0x674   :  { %1974 = vmatmul.mubr.f32.vlgmr.msra.gmra.mrb[6].mxu1 %v1468_v60 }
 0x675   :  { %2093 = vmatpush3.bf16.msra.mxu1 %v2090_v26 }
 0x676   :  { %2095 = vmatprep.subr.bf16.mxu1 %v2094_v42 }
 0x679   :  { %2097 = vmatpush3.bf16.msra.mxu1 %v2094_v42 }
 0x747   :  { %v1975_v34 = vpop.f32.mrb[6].mxu1 }
 0x748   :  { %v1560_v23 = vadd.f32 %v1975_v34, %v1485_v62  ;;  %v1554_v46 = vpop.f32.mrb[7].mxu1 }
 0x749   :  { %v1555_v63 = vadd.f32 %v1554_v46, %v1485_v62 }
 0x74a   :  { %v1564_v20 = vsel %vm1239_vm15, %v1560_v23, 0.0 }
 0x74b   :  { %v1563_v41 = vsel %vm1239_vm15, %v1555_v63, 0.0 }
 0x74c   :  { %v1565_v2 = vadd.f32 %v1564_v20, %v1563_v41 }
 0x74e   :  { %v1566_v51 = vrot.slane %v1565_v2, 4 }
 0x750   :  { %v1567_v22 = vadd.f32 %v1566_v51, %v1565_v2 }
 0x752   :  { %v1568_v25 = vrot.slane %v1567_v22, 2 }
 0x754   :  { %v1569_v53 = vadd.f32 %v1568_v25, %v1567_v22 }
 0x756   :  { %v1570_v44 = vrot.slane %v1569_v53, 1 }
 0x758   :  { %v1571_v37 = vadd.f32 %v1570_v44, %v1569_v53 }
 0x75a   :  { %v1572_v33 = vmul.f32 0.0625, %v1571_v37 }
 0x75c   :  { %v1573_v14 = vsub.f32 %v1555_v63, %v1572_v33  ;;  %v1574_v10 = vsub.f32 %v1560_v23, %v1572_v33 }
 0x75e   :  { %v1575_v40 = vmul.f32 %v1573_v14, %v1573_v14  ;;  %v1576_v18 = vmul.f32 %v1574_v10, %v1574_v10  ;;  %v1587_v11 = vmul.f32 %v1573_v14, %v1486_v39  ;;  %v1588_v21 = vmul.f32 %v1574_v10, %v1486_v39  ;;  %v1606_v14 = vld [vmem:[%s2997_s4 + $0x12] ss:$0 sm:$0xff] }
 0x760   :  { %v1577_v52 = vsel %vm1239_vm15, %v1575_v40, 0.0  ;;  %v1578_v7 = vsel %vm1239_vm15, %v1576_v18, 0.0 }
 0x761   :  { %v1579_v35 = vadd.f32 %v1578_v7, %v1577_v52  ;;  %v1607_v52 = vld [vmem:[%s2997_s4 + $0x13] ss:$0 sm:$0xff] }
 0x763   :  { %v1580_v50 = vrot.slane %v1579_v35, 4 }
 0x765   :  { %v1581_v15 = vadd.f32 %v1580_v50, %v1579_v35 }
 0x767   :  { %v1582_v19 = vrot.slane %v1581_v15, 2 }
 0x769   :  { %v1583_v28 = vadd.f32 %v1582_v19, %v1581_v15 }
 0x76b   :  { %v1584_v8 = vrot.slane %v1583_v28, 1 }
 0x76d   :  { %v1585_v13 = vadd.f32 %v1584_v8, %v1583_v28  ;;  %v1728_v8 = vld [vmem:[%s2997_s4 + $0x14] ss:$0 sm:$0xff] }
 0x76f   :  { %v1586_v16 = vmul.f32 0.0625, %v1585_v13 }
 0x771   :  { %v1589_v55 = vadd.f32 1e-05, %v1586_v16 }
 0x773   :  { %2275 = vrsqrt.f32 %v1589_v55 }
 0x77d   :  { %v2276_v58 = vpop.eup %2275 }
 0x77e   :  { %v1591_v36 = vmul.f32 %v2276_v58, %v1587_v11  ;;  %v1592_v17 = vmul.f32 %v2276_v58, %v1588_v21 }
 0x780   :  { %v1593_v61 = vadd.f32 %v1591_v36, %v1487_v5  ;;  %v1594_v6 = vadd.f32 %v1592_v17, %v1487_v5 }
 0x782   :  { %v1595_v49 = vmax.f32 %v1593_v61, 0.0  ;;  %v1596_v56 = vmax.f32 %v1594_v6, 0.0 }
 0x784   :  { %1992 = vmatprep.mubr.msk.f32.mxu0 %vm1239_vm15, %v1595_v49 }
 0x785   :  { %1993 = vmatmul.mubr.msk.f32.vlgmr.msra.gmra.mrb[4].mxu0 %vm1239_vm15, %v1596_v56 }
 0x858   :  { %v1994_v9 = vpop.f32.mrb[4].mxu0 }
 0x859   :  { %v1686_v60 = vadd.f32 %v1994_v9, %v1605_v27  ;;  %v1680_v31 = vpop.f32.mrb[5].mxu0 }
 0x85a   :  { %v1681_v0 = vadd.f32 %v1680_v31, %v1605_v27 }
 0x85b   :  { %v1691_v45 = vsel %vm1689_vm0, %v1686_v60, 0.0 }
 0x85c   :  { %v1690_v4 = vsel %vm1689_vm0, %v1681_v0, 0.0 }
 0x85d   :  { %v1692_v1 = vadd.f32 %v1691_v45, %v1690_v4 }
 0x85f   :  { %v1693_v57 = vrot.slane %v1692_v1, 4 }
 0x861   :  { %v1694_v54 = vadd.f32 %v1693_v57, %v1692_v1 }
 0x863   :  { %v1695_v12 = vrot.slane %v1694_v54, 2 }
 0x865   :  { %v1696_v29 = vadd.f32 %v1695_v12, %v1694_v54 }
 0x867   :  { %v1697_v38 = vrot.slane %v1696_v29, 1 }
 0x869   :  { %v1698_v48 = vadd.f32 %v1697_v38, %v1696_v29 }
 0x86b   :  { %v1699_v24 = vmul.f32 0.0625, %v1698_v48 }
 0x86d   :  { %v1700_v62 = vsub.f32 %v1681_v0, %v1699_v24  ;;  %v1701_v34 = vsub.f32 %v1686_v60, %v1699_v24 }
 0x86f   :  { %v1702_v23 = vmul.f32 %v1700_v62, %v1700_v62  ;;  %v1703_v46 = vmul.f32 %v1701_v34, %v1701_v34  ;;  %v1714_v10 = vmul.f32 %v1700_v62, %v1606_v14  ;;  %v1715_v40 = vmul.f32 %v1701_v34, %v1606_v14 }
 0x871   :  { %v1704_v63 = vsel %vm1689_vm0, %v1702_v23, 0.0  ;;  %v1705_v20 = vsel %vm1689_vm0, %v1703_v46, 0.0 }
 0x872   :  { %v1706_v41 = vadd.f32 %v1705_v20, %v1704_v63 }
 0x874   :  { %v1707_v2 = vrot.slane %v1706_v41, 4 }
 0x876   :  { %v1708_v51 = vadd.f32 %v1707_v2, %v1706_v41 }
 0x878   :  { %v1709_v22 = vrot.slane %v1708_v51, 2 }
 0x87a   :  { %v1710_v25 = vadd.f32 %v1709_v22, %v1708_v51 }
 0x87c   :  { %v1711_v53 = vrot.slane %v1710_v25, 1 }
 0x87e   :  { %v1712_v44 = vadd.f32 %v1711_v53, %v1710_v25 }
 0x880   :  { %v1713_v37 = vmul.f32 0.0625, %v1712_v44 }
 0x882   :  { %v1716_v33 = vadd.f32 1e-05, %v1713_v37 }
 0x884   :  { %2277 = vrsqrt.f32 %v1716_v33 }
 0x88e   :  { %v2278_v18 = vpop.eup %2277 }
 0x88f   :  { %v1718_v7 = vmul.f32 %v2278_v18, %v1714_v10  ;;  %v1719_v35 = vmul.f32 %v2278_v18, %v1715_v40 }
 0x891   :  { %v1720_v50 = vadd.f32 %v1718_v7, %v1607_v52  ;;  %v1721_v15 = vadd.f32 %v1719_v35, %v1607_v52 }
 0x893   :  { %v1722_v19 = vmax.f32 %v1720_v50, 0.0  ;;  %v1723_v28 = vmax.f32 %v1721_v15, 0.0 }
 0x895   :  { %2003 = vmatprep.mubr.msk.f32.mxu1 %vm1689_vm0, %v1722_v19 }
 0x896   :  { %2004 = vmatmul.mubr.msk.f32.vlgmr.msra.gmra.mrb[8].mxu1 %vm1689_vm0, %v1723_v28 }
 0x969   :  { %v2005_v13 = vpop.f32.mrb[8].mxu1 }
 0x96a   :  { %v1807_v16 = vadd.f32 %v2005_v13, %v1728_v8  ;;  %v1801_v55 = vpop.f32.mrb[9].mxu1 }
 0x96b   :  { %v1802_v39 = vadd.f32 %v1801_v55, %v1728_v8 }
 0x96c   :  { %v1811_v11 = vadd.f32 %v1807_v16, %v2887_v32 }
 0x96d   :  { %v1810_v21 = vadd.f32 %v1802_v39, %v2880_v30 }
 0x96e   :  { %1813 = vst.msk [vmem:[%s2999_s6 + $0x8] sm:$0xff] %vm285_vm1, %v1811_v11 }
 0x96f   :  { %1812 = vst.msk [vmem:[%s2999_s6] sm:$0xff] %vm285_vm1, %v1810_v21 }
 0x970   :  { %1818 = vsyncpa [#allocation4], 1 }

</bundles_post_ra>
